<compile_context>
chip_gen: v5e
topology: v5e:2x2
jax: 0.10.0
libtpu: 0.0.40
codegen_flags: <defaults>
</compile_context>

<pallas_src>
import functools
import math

import jax
import jax.numpy as jnp
import numpy as np
from jax.experimental import pallas as pl
from jax.experimental.pallas import tpu as pltpu

LN_EPS = 1e-5


def _layernorm(x, gamma, beta):
    # x: (S, D); gamma/beta: (1, D). Biased variance (PyTorch LayerNorm).
    mean = jnp.mean(x, axis=-1, keepdims=True)
    centered = x - mean
    var = jnp.mean(centered * centered, axis=-1, keepdims=True)
    inv = jax.lax.rsqrt(var + LN_EPS)
    return centered * inv * gamma + beta


def _decoder_block_body(
    x_ref, addmask,
    wqkv_ref, bqkv_ref, wo_ref, bo_ref,
    g1_ref, be1_ref,
    w1_ref, b1_ref, w2_ref, b2_ref,
    g2_ref, be2_ref,
    out_ref,
    *, num_heads):
    x = x_ref[0]                                  # (S, D) float32
    S, D = x.shape
    Dh = D // num_heads
    xb = x.astype(jnp.bfloat16)

    if addmask is None:
        # Causal additive mask generated in-kernel (no (S, S) DMA).
        row = jax.lax.broadcasted_iota(jnp.int32, (S, S), 0)
        col = jax.lax.broadcasted_iota(jnp.int32, (S, S), 1)
        addmask = jnp.where(col > row, jnp.float32(-1e9), jnp.float32(0.0))

    # --- fused QKV projection: one (S, D) @ (D, 3D) MXU matmul -------------
    # 1/sqrt(Dh) is already folded into the q-portion of wqkv / bqkv.
    # (bk only shifts scores by a per-row constant; softmax is invariant to
    #  it, but it is kept for bit-closeness to the reference.)
    qkv = jnp.dot(xb, wqkv_ref[...], preferred_element_type=jnp.float32)
    qkv = (qkv + bqkv_ref[...]).astype(jnp.bfloat16)   # single cast for q/k/v

    # --- per-head attention core (scores / softmax / context) --------------
    ctx_parts = []
    for h in range(num_heads):
        qh = qkv[:, h * Dh:(h + 1) * Dh]                    # (S, Dh) bf16
        kh = qkv[:, D + h * Dh:D + (h + 1) * Dh]            # (S, Dh) bf16
        vh = qkv[:, 2 * D + h * Dh:2 * D + (h + 1) * Dh]    # (S, Dh) bf16

        # scores: contract Dh of q and k (no explicit transpose materialized)
        scores = jax.lax.dot_general(
            qh, kh, (((1,), (1,)), ((), ())),
            preferred_element_type=jnp.float32)             # (S, S) f32
        scores = scores + addmask

        m = jnp.max(scores, axis=-1, keepdims=True)
        p = jnp.exp(scores - m)
        p = p * pl.reciprocal(jnp.sum(p, axis=-1, keepdims=True), approx=True)

        ctx = jnp.dot(p.astype(jnp.bfloat16), vh,
                      preferred_element_type=jnp.float32)   # (S, Dh) f32
        ctx_parts.append(ctx.astype(jnp.bfloat16))

    # --- fused output projection: one (S, D) @ (D, D) full-K matmul --------
    ctx_all = jnp.concatenate(ctx_parts, axis=-1)           # (S, D) bf16
    attn = jnp.dot(ctx_all, wo_ref[...],
                   preferred_element_type=jnp.float32) + bo_ref[...]

    # residual + LayerNorm 1 (dropout1 == identity)
    h1 = _layernorm(x + attn, g1_ref[...], be1_ref[...])

    # --- feed-forward -------------------------------------------------------
    ff = jnp.dot(h1.astype(jnp.bfloat16), w1_ref[...],
                 preferred_element_type=jnp.float32) + b1_ref[...]
    ffb = jnp.maximum(ff, 0.0).astype(jnp.bfloat16)   # relu + bf16 in one step
    ff2 = jnp.dot(ffb, w2_ref[...],
                  preferred_element_type=jnp.float32) + b2_ref[...]

    # residual + LayerNorm 2 (dropout2 == identity)
    out_ref[0] = _layernorm(h1 + ff2, g2_ref[...], be2_ref[...])


def _kernel_causal(x_ref, *refs, num_heads):
    _decoder_block_body(x_ref, None, *refs, num_heads=num_heads)


def _kernel_masked(x_ref, mask_ref, *refs, num_heads):
    # mask is passed in bf16 (halved DMA / VMEM); cast once before the loop.
    _decoder_block_body(x_ref, mask_ref[...].astype(jnp.float32), *refs,
                        num_heads=num_heads)


def prepare_kernel_params(params, num_heads):
    """Convert f32 'PyTorch-layout' params into the kernel layout:
       fused QKV weight/bias, 1/sqrt(Dh) folded into the q portion,
       all matmul weights in bf16, biases / LN params in f32."""
    D = params["wq"].shape[0]
    Dh = D // num_heads
    scale = 1.0 / math.sqrt(Dh)
    bf16, f32 = jnp.bfloat16, jnp.float32

    w_qkv = jnp.concatenate(
        [params["wq"] * scale, params["wk"], params["wv"]], axis=1).astype(bf16)
    b_qkv = jnp.concatenate(
        [params["bq"] * scale, params["bk"], params["bv"]], axis=1).astype(f32)

    return {
        "w_qkv": w_qkv,                       # (D, 3D) bf16
        "b_qkv": b_qkv,                       # (1, 3D) f32
        "wo": params["wo"].astype(bf16),      # (D, D)  bf16 (un-split)
        "bo": params["bo"].astype(f32),
        "ln1_g": params["ln1_g"].astype(f32),
        "ln1_b": params["ln1_b"].astype(f32),
        "w1": params["w1"].astype(bf16),
        "b1": params["b1"].astype(f32),
        "w2": params["w2"].astype(bf16),
        "b2": params["b2"].astype(f32),
        "ln2_g": params["ln2_g"].astype(f32),
        "ln2_b": params["ln2_b"].astype(f32),
    }


def _vmem_cap_bytes():
    """Chip-aware VMEM cap (leave headroom); safe fallback if unavailable."""
    try:
        cap = int(pltpu.get_tpu_info().vmem_capacity_bytes)
        return max(32 * 2**20, cap - 8 * 2**20)
    except Exception:
        return 48 * 2**20


def decoder_block_forward(x, target_mask, kparams, num_heads, batch_first=False):
    """x: (seq, batch, d_model) f32 (or (batch, seq, d_model) if batch_first
       -- the batch_first path avoids the host-side layout transposes).
       target_mask: (S, S) additive float mask, or None for in-kernel causal."""
    if batch_first:
        B, S, D = x.shape
        x_bsd = x
    else:
        S, B, D = x.shape
        x_bsd = jnp.transpose(x, (1, 0, 2))              # (B, S, D)

    F = kparams["w1"].shape[1]
    causal = target_mask is None

    weight_args = (
        kparams["w_qkv"], kparams["b_qkv"], kparams["wo"], kparams["bo"],
        kparams["ln1_g"], kparams["ln1_b"],
        kparams["w1"], kparams["b1"], kparams["w2"], kparams["b2"],
        kparams["ln2_g"], kparams["ln2_b"],
    )

    if causal:
        kernel = functools.partial(_kernel_causal, num_heads=num_heads)
        mask_args = ()
    else:
        kernel = functools.partial(_kernel_masked, num_heads=num_heads)
        mask_args = (target_mask.astype(jnp.bfloat16),)

    # VMEM budget: single-buffered weights + activation blocks + in-kernel
    # temporaries (qkv slab, scores, context, FFN intermediate, residuals).
    weight_bytes = sum(int(np.prod(w.shape)) * w.dtype.itemsize
                       for w in weight_args)
    temp_bytes = (
        2 * 2 * S * D * 4            # double-buffered x / out blocks
        + S * 3 * D * (4 + 2)        # qkv slab f32 + bf16
        + 3 * S * S * 4              # scores / probs / mask temporaries
        + S * D * 2                  # concatenated context (bf16)
        + S * F * (4 + 2)            # FFN intermediate f32 + bf16
        + 4 * S * D * 4              # attn / h1 / residual temps
        + (0 if causal else S * S * 2))
    vmem_limit = int(min(_vmem_cap_bytes(),
                         weight_bytes + temp_bytes + 8 * 2**20))
    vmem_limit = max(vmem_limit, 32 * 2**20)

    def run(weight_mode):
        def inv(shape):
            # Grid-invariant (whole-array) block; single-buffered when
            # weight_mode is pl.Buffered(1) (index_map never changes).
            nd = len(shape)
            if weight_mode is None:
                return pl.BlockSpec(shape, lambda b, _nd=nd: (0,) * _nd)
            return pl.BlockSpec(shape, lambda b, _nd=nd: (0,) * _nd,
                                pipeline_mode=weight_mode)

        x_spec = pl.BlockSpec((1, S, D), lambda b: (b, 0, 0))
        out_spec = pl.BlockSpec((1, S, D), lambda b: (b, 0, 0))
        weight_specs = [
            inv((D, 3 * D)), inv((1, 3 * D)),              # w_qkv  b_qkv
            inv((D, D)), inv((1, D)),                      # wo     bo
            inv((1, D)), inv((1, D)),                      # ln1 gamma / beta
            inv((D, F)), inv((1, F)), inv((F, D)), inv((1, D)),  # w1 b1 w2 b2
            inv((1, D)), inv((1, D)),                      # ln2 gamma / beta
        ]
        if causal:
            in_specs = [x_spec] + weight_specs
        else:
            in_specs = [x_spec, inv((S, S))] + weight_specs

        return pl.pallas_call(
            kernel,
            out_shape=jax.ShapeDtypeStruct((B, S, D), jnp.float32),
            grid_spec=pltpu.PrefetchScalarGridSpec(
                num_scalar_prefetch=0,
                grid=(B,),
                in_specs=in_specs,
                out_specs=out_spec,
            ),
            compiler_params=pltpu.CompilerParams(
                dimension_semantics=("parallel",),
                vmem_limit_bytes=vmem_limit,
            ),
        )(x_bsd, *mask_args, *weight_args)

    try:
        out_bsd = run(pl.Buffered(1))       # single-buffer grid-invariant args
    except Exception:                        # older JAX without Buffered(1)
        out_bsd = run(None)

    if batch_first:
        return out_bsd
    return jnp.transpose(out_bsd, (1, 0, 2))              # back to (S, B, D)


def reference_forward(x_sbd, target_mask, params, num_heads):
    """Pure-JAX f32 replica of the PyTorch forward (dropout=identity)."""
    S, B, D = x_sbd.shape
    Dh = D // num_heads
    x = jnp.transpose(x_sbd, (1, 0, 2))                   # (B, S, D)

    q = x @ params["wq"] + params["bq"]
    k = x @ params["wk"] + params["bk"]
    v = x @ params["wv"] + params["bv"]

    def split(t):
        return t.reshape(B, S, num_heads, Dh).transpose(0, 2, 1, 3)  # (B,H,S,Dh)

    qh, kh, vh = split(q), split(k), split(v)
    scores = jnp.einsum("bhqd,bhkd->bhqk", qh, kh) / math.sqrt(Dh) + target_mask
    p = jax.nn.softmax(scores, axis=-1)
    attn = jnp.einsum("bhqk,bhkd->bhqd", p, vh).transpose(0, 2, 1, 3).reshape(B, S, D)
    attn = attn @ params["wo"] + params["bo"]

    def ln(y, g, b):
        mu = y.mean(-1, keepdims=True)
        var = ((y - mu) ** 2).mean(-1, keepdims=True)
        return (y - mu) / jnp.sqrt(var + LN_EPS) * g + b

    h1 = ln(x + attn, params["ln1_g"], params["ln1_b"])
    ff = jax.nn.relu(h1 @ params["w1"] + params["b1"]) @ params["w2"] + params["b2"]
    out = ln(h1 + ff, params["ln2_g"], params["ln2_b"])
    return jnp.transpose(out, (1, 0, 2))


def init_params(key, d_model, num_heads, ff_hidden):
    ks = jax.random.split(key, 10)
    s = 0.05
    f32 = jnp.float32
    return {
        "wq": s * jax.random.normal(ks[0], (d_model, d_model), f32),
        "wk": s * jax.random.normal(ks[1], (d_model, d_model), f32),
        "wv": s * jax.random.normal(ks[2], (d_model, d_model), f32),
        "bq": s * jax.random.normal(ks[3], (1, d_model), f32),
        "bk": s * jax.random.normal(ks[4], (1, d_model), f32),
        "bv": s * jax.random.normal(ks[5], (1, d_model), f32),
        "wo": s * jax.random.normal(ks[6], (d_model, d_model), f32),
        "bo": s * jax.random.normal(ks[7], (1, d_model), f32),
        "ln1_g": jnp.ones((1, d_model), f32),
        "ln1_b": jnp.zeros((1, d_model), f32),
        "w1": s * jax.random.normal(ks[8], (d_model, ff_hidden), f32),
        "b1": jnp.zeros((1, ff_hidden), f32),
        "w2": s * jax.random.normal(ks[9], (ff_hidden, d_model), f32),
        "b2": jnp.zeros((1, d_model), f32),
        "ln2_g": jnp.ones((1, d_model), f32),
        "ln2_b": jnp.zeros((1, d_model), f32),
    }


if __name__ == "__main__":
    seq, batch, d_model, num_heads, ff_hidden = 8, 2, 32, 4, 64

    key = jax.random.PRNGKey(0)
    kx, kp = jax.random.split(key)
    x = jax.random.normal(kx, (seq, batch, d_model), jnp.float32)   # (S, B, D)
    params = init_params(kp, d_model, num_heads, ff_hidden)
    kparams = prepare_kernel_params(params, num_heads)

    # Causal additive float mask (0 = attend, -1e9 = masked), like
    # torch.triu(torch.full((S, S), float('-inf')), diagonal=1).
    causal_mask = jnp.where(
        jnp.triu(jnp.ones((seq, seq), bool), k=1), -1e9, 0.0
    ).astype(jnp.float32)

    # Fast path: causal mask generated in-kernel (no (S, S) DMA).
    out_causal = jax.block_until_ready(
        decoder_block_forward(x, None, kparams, num_heads))

    # General path: explicit additive attn_mask (matches module signature).
    out_masked = jax.block_until_ready(
        decoder_block_forward(x, causal_mask, kparams, num_heads))

    ref = reference_forward(x, causal_mask, params, num_heads)

    # bf16 matmuls + approx reciprocal -> slightly looser tolerance than f32.
    np.testing.assert_allclose(np.asarray(out_causal), np.asarray(ref),
                               rtol=2e-2, atol=2e-2)
    np.testing.assert_allclose(np.asarray(out_masked), np.asarray(ref),
                               rtol=2e-2, atol=2e-2)

    print("KERNEL_OK")
</pallas_src>

<mosaic_0001>
module attributes {stable_mosaic.version = 11 : i64} {
  func.func @_kernel_causal(%arg0: i32, %arg1: memref<1x8x32xf32, #tpu.memory_space<vmem>>, %arg2: memref<32x96xbf16, #tpu.memory_space<vmem>>, %arg3: memref<1x96xf32, #tpu.memory_space<vmem>>, %arg4: memref<32x32xbf16, #tpu.memory_space<vmem>>, %arg5: memref<1x32xf32, #tpu.memory_space<vmem>>, %arg6: memref<1x32xf32, #tpu.memory_space<vmem>>, %arg7: memref<1x32xf32, #tpu.memory_space<vmem>>, %arg8: memref<32x64xbf16, #tpu.memory_space<vmem>>, %arg9: memref<1x64xf32, #tpu.memory_space<vmem>>, %arg10: memref<64x32xbf16, #tpu.memory_space<vmem>>, %arg11: memref<1x32xf32, #tpu.memory_space<vmem>>, %arg12: memref<1x32xf32, #tpu.memory_space<vmem>>, %arg13: memref<1x32xf32, #tpu.memory_space<vmem>>, %arg14: memref<1x8x32xf32, #tpu.memory_space<vmem>>) attributes {dimension_semantics = [#tpu.dimension_semantics<parallel>], iteration_bounds = array<i64: 2>, scalar_prefetch = 0 : i64, scratch_operands = 0 : i64, tpu.core_type = #tpu.core_type<tc>, window_params = [{transform_indices = @transform_0, window_bounds = array<i64: 1, 8, 32>}, {pipeline_mode = #tpu.pipeline_mode<synchronous>, transform_indices = @transform_1, window_bounds = array<i64: 32, 96>}, {pipeline_mode = #tpu.pipeline_mode<synchronous>, transform_indices = @transform_2, window_bounds = array<i64: 1, 96>}, {pipeline_mode = #tpu.pipeline_mode<synchronous>, transform_indices = @transform_3, window_bounds = array<i64: 32, 32>}, {pipeline_mode = #tpu.pipeline_mode<synchronous>, transform_indices = @transform_4, window_bounds = array<i64: 1, 32>}, {pipeline_mode = #tpu.pipeline_mode<synchronous>, transform_indices = @transform_5, window_bounds = array<i64: 1, 32>}, {pipeline_mode = #tpu.pipeline_mode<synchronous>, transform_indices = @transform_6, window_bounds = array<i64: 1, 32>}, {pipeline_mode = #tpu.pipeline_mode<synchronous>, transform_indices = @transform_7, window_bounds = array<i64: 32, 64>}, {pipeline_mode = #tpu.pipeline_mode<synchronous>, transform_indices = @transform_8, window_bounds = array<i64: 1, 64>}, {pipeline_mode = #tpu.pipeline_mode<synchronous>, transform_indices = @transform_9, window_bounds = array<i64: 64, 32>}, {pipeline_mode = #tpu.pipeline_mode<synchronous>, transform_indices = @transform_10, window_bounds = array<i64: 1, 32>}, {pipeline_mode = #tpu.pipeline_mode<synchronous>, transform_indices = @transform_11, window_bounds = array<i64: 1, 32>}, {pipeline_mode = #tpu.pipeline_mode<synchronous>, transform_indices = @transform_12, window_bounds = array<i64: 1, 32>}, {transform_indices = @transform_13, window_bounds = array<i64: 1, 8, 32>}]} {
    %c0 = arith.constant 0 : index
    %c0_0 = arith.constant 0 : index
    %c0_1 = arith.constant 0 : index
    %0 = vector.load %arg1[%c0, %c0_0, %c0_1] : memref<1x8x32xf32, #tpu.memory_space<vmem>>, vector<1x8x32xf32>
    %1 = vector.shape_cast %0 : vector<1x8x32xf32> to vector<8x32xf32>
    %2 = arith.truncf %1 : vector<8x32xf32> to vector<8x32xbf16>
    %3 = tpu.iota {dimensions = array<i32: 0>} : vector<8x8xi32>
    %4 = tpu.iota {dimensions = array<i32: 1>} : vector<8x8xi32>
    %5 = arith.cmpi sgt, %4, %3 : vector<8x8xi32>
    %cst = arith.constant -1.000000e+09 : f32
    %cst_2 = arith.constant 0.000000e+00 : f32
    %6 = vector.broadcast %cst : f32 to vector<8x8xf32>
    %7 = vector.broadcast %cst_2 : f32 to vector<8x8xf32>
    %8 = arith.select %5, %6, %7 : vector<8x8xi1>, vector<8x8xf32>
    %c0_3 = arith.constant 0 : index
    %c0_4 = arith.constant 0 : index
    %9 = vector.load %arg2[%c0_3, %c0_4] : memref<32x96xbf16, #tpu.memory_space<vmem>>, vector<32x96xbf16>
    %cst_5 = arith.constant dense<0.000000e+00> : vector<8x96xf32>
    %10 = tpu.matmul %2, %9, %cst_5 {dimension_numbers = #tpu.dot_dimension_numbers<[1], [0], [0], [1], [0, 0, 1, 1], [], []>} : vector<8x32xbf16>, vector<32x96xbf16>, vector<8x96xf32> -> vector<8x96xf32>
    %c0_6 = arith.constant 0 : index
    %c0_7 = arith.constant 0 : index
    %11 = vector.load %arg3[%c0_6, %c0_7] : memref<1x96xf32, #tpu.memory_space<vmem>>, vector<1x96xf32>
    %12 = vector.broadcast %11 : vector<1x96xf32> to vector<8x96xf32>
    %13 = arith.addf %10, %12 : vector<8x96xf32>
    %14 = arith.truncf %13 : vector<8x96xf32> to vector<8x96xbf16>
    %15 = vector.extract_strided_slice %14 {offsets = [0, 0], sizes = [8, 8], strides = [1, 1]} : vector<8x96xbf16> to vector<8x8xbf16>
    %16 = vector.extract_strided_slice %14 {offsets = [0, 32], sizes = [8, 8], strides = [1, 1]} : vector<8x96xbf16> to vector<8x8xbf16>
    %17 = vector.extract_strided_slice %14 {offsets = [0, 64], sizes = [8, 8], strides = [1, 1]} : vector<8x96xbf16> to vector<8x8xbf16>
    %cst_8 = arith.constant dense<0.000000e+00> : vector<8x8xf32>
    %18 = tpu.matmul %15, %16, %cst_8 {dimension_numbers = #tpu.dot_dimension_numbers<[1], [1], [0], [0], [0, 0, 1, 0], [], []>} : vector<8x8xbf16>, vector<8x8xbf16>, vector<8x8xf32> -> vector<8x8xf32>
    %19 = arith.addf %18, %8 : vector<8x8xf32>
    %cst_9 = arith.constant dense<0xFF800000> : vector<8xf32>
    %20 = vector.multi_reduction <maximumf>, %19, %cst_9 [1] : vector<8x8xf32> to vector<8xf32>
    %21 = vector.shape_cast %20 : vector<8xf32> to vector<8x1xf32>
    %22 = vector.broadcast %21 : vector<8x1xf32> to vector<8x8xf32>
    %23 = arith.subf %19, %22 : vector<8x8xf32>
    %24 = math.exp %23 : vector<8x8xf32>
    %cst_10 = arith.constant dense<0.000000e+00> : vector<8xf32>
    %25 = vector.multi_reduction <add>, %24, %cst_10 [1] : vector<8x8xf32> to vector<8xf32>
    %26 = vector.shape_cast %25 : vector<8xf32> to vector<8x1xf32>
    %27 = tpu.reciprocal %26 {approx = true} : vector<8x1xf32> -> vector<8x1xf32>
    %28 = vector.broadcast %27 : vector<8x1xf32> to vector<8x8xf32>
    %29 = arith.mulf %24, %28 : vector<8x8xf32>
    %30 = arith.truncf %29 : vector<8x8xf32> to vector<8x8xbf16>
    %cst_11 = arith.constant dense<0.000000e+00> : vector<8x8xf32>
    %31 = tpu.matmul %30, %17, %cst_11 {dimension_numbers = #tpu.dot_dimension_numbers<[1], [0], [0], [1], [0, 0, 1, 1], [], []>} : vector<8x8xbf16>, vector<8x8xbf16>, vector<8x8xf32> -> vector<8x8xf32>
    %32 = arith.truncf %31 : vector<8x8xf32> to vector<8x8xbf16>
    %33 = vector.extract_strided_slice %14 {offsets = [0, 8], sizes = [8, 8], strides = [1, 1]} : vector<8x96xbf16> to vector<8x8xbf16>
    %34 = vector.extract_strided_slice %14 {offsets = [0, 40], sizes = [8, 8], strides = [1, 1]} : vector<8x96xbf16> to vector<8x8xbf16>
    %35 = vector.extract_strided_slice %14 {offsets = [0, 72], sizes = [8, 8], strides = [1, 1]} : vector<8x96xbf16> to vector<8x8xbf16>
    %cst_12 = arith.constant dense<0.000000e+00> : vector<8x8xf32>
    %36 = tpu.matmul %33, %34, %cst_12 {dimension_numbers = #tpu.dot_dimension_numbers<[1], [1], [0], [0], [0, 0, 1, 0], [], []>} : vector<8x8xbf16>, vector<8x8xbf16>, vector<8x8xf32> -> vector<8x8xf32>
    %37 = arith.addf %36, %8 : vector<8x8xf32>
    %cst_13 = arith.constant dense<0xFF800000> : vector<8xf32>
    %38 = vector.multi_reduction <maximumf>, %37, %cst_13 [1] : vector<8x8xf32> to vector<8xf32>
    %39 = vector.shape_cast %38 : vector<8xf32> to vector<8x1xf32>
    %40 = vector.broadcast %39 : vector<8x1xf32> to vector<8x8xf32>
    %41 = arith.subf %37, %40 : vector<8x8xf32>
    %42 = math.exp %41 : vector<8x8xf32>
    %cst_14 = arith.constant dense<0.000000e+00> : vector<8xf32>
    %43 = vector.multi_reduction <add>, %42, %cst_14 [1] : vector<8x8xf32> to vector<8xf32>
    %44 = vector.shape_cast %43 : vector<8xf32> to vector<8x1xf32>
    %45 = tpu.reciprocal %44 {approx = true} : vector<8x1xf32> -> vector<8x1xf32>
    %46 = vector.broadcast %45 : vector<8x1xf32> to vector<8x8xf32>
    %47 = arith.mulf %42, %46 : vector<8x8xf32>
    %48 = arith.truncf %47 : vector<8x8xf32> to vector<8x8xbf16>
    %cst_15 = arith.constant dense<0.000000e+00> : vector<8x8xf32>
    %49 = tpu.matmul %48, %35, %cst_15 {dimension_numbers = #tpu.dot_dimension_numbers<[1], [0], [0], [1], [0, 0, 1, 1], [], []>} : vector<8x8xbf16>, vector<8x8xbf16>, vector<8x8xf32> -> vector<8x8xf32>
    %50 = arith.truncf %49 : vector<8x8xf32> to vector<8x8xbf16>
    %51 = vector.extract_strided_slice %14 {offsets = [0, 16], sizes = [8, 8], strides = [1, 1]} : vector<8x96xbf16> to vector<8x8xbf16>
    %52 = vector.extract_strided_slice %14 {offsets = [0, 48], sizes = [8, 8], strides = [1, 1]} : vector<8x96xbf16> to vector<8x8xbf16>
    %53 = vector.extract_strided_slice %14 {offsets = [0, 80], sizes = [8, 8], strides = [1, 1]} : vector<8x96xbf16> to vector<8x8xbf16>
    %cst_16 = arith.constant dense<0.000000e+00> : vector<8x8xf32>
    %54 = tpu.matmul %51, %52, %cst_16 {dimension_numbers = #tpu.dot_dimension_numbers<[1], [1], [0], [0], [0, 0, 1, 0], [], []>} : vector<8x8xbf16>, vector<8x8xbf16>, vector<8x8xf32> -> vector<8x8xf32>
    %55 = arith.addf %54, %8 : vector<8x8xf32>
    %cst_17 = arith.constant dense<0xFF800000> : vector<8xf32>
    %56 = vector.multi_reduction <maximumf>, %55, %cst_17 [1] : vector<8x8xf32> to vector<8xf32>
    %57 = vector.shape_cast %56 : vector<8xf32> to vector<8x1xf32>
    %58 = vector.broadcast %57 : vector<8x1xf32> to vector<8x8xf32>
    %59 = arith.subf %55, %58 : vector<8x8xf32>
    %60 = math.exp %59 : vector<8x8xf32>
    %cst_18 = arith.constant dense<0.000000e+00> : vector<8xf32>
    %61 = vector.multi_reduction <add>, %60, %cst_18 [1] : vector<8x8xf32> to vector<8xf32>
    %62 = vector.shape_cast %61 : vector<8xf32> to vector<8x1xf32>
    %63 = tpu.reciprocal %62 {approx = true} : vector<8x1xf32> -> vector<8x1xf32>
    %64 = vector.broadcast %63 : vector<8x1xf32> to vector<8x8xf32>
    %65 = arith.mulf %60, %64 : vector<8x8xf32>
    %66 = arith.truncf %65 : vector<8x8xf32> to vector<8x8xbf16>
    %cst_19 = arith.constant dense<0.000000e+00> : vector<8x8xf32>
    %67 = tpu.matmul %66, %53, %cst_19 {dimension_numbers = #tpu.dot_dimension_numbers<[1], [0], [0], [1], [0, 0, 1, 1], [], []>} : vector<8x8xbf16>, vector<8x8xbf16>, vector<8x8xf32> -> vector<8x8xf32>
    %68 = arith.truncf %67 : vector<8x8xf32> to vector<8x8xbf16>
    %69 = vector.extract_strided_slice %14 {offsets = [0, 24], sizes = [8, 8], strides = [1, 1]} : vector<8x96xbf16> to vector<8x8xbf16>
    %70 = vector.extract_strided_slice %14 {offsets = [0, 56], sizes = [8, 8], strides = [1, 1]} : vector<8x96xbf16> to vector<8x8xbf16>
    %71 = vector.extract_strided_slice %14 {offsets = [0, 88], sizes = [8, 8], strides = [1, 1]} : vector<8x96xbf16> to vector<8x8xbf16>
    %cst_20 = arith.constant dense<0.000000e+00> : vector<8x8xf32>
    %72 = tpu.matmul %69, %70, %cst_20 {dimension_numbers = #tpu.dot_dimension_numbers<[1], [1], [0], [0], [0, 0, 1, 0], [], []>} : vector<8x8xbf16>, vector<8x8xbf16>, vector<8x8xf32> -> vector<8x8xf32>
    %73 = arith.addf %72, %8 : vector<8x8xf32>
    %cst_21 = arith.constant dense<0xFF800000> : vector<8xf32>
    %74 = vector.multi_reduction <maximumf>, %73, %cst_21 [1] : vector<8x8xf32> to vector<8xf32>
    %75 = vector.shape_cast %74 : vector<8xf32> to vector<8x1xf32>
    %76 = vector.broadcast %75 : vector<8x1xf32> to vector<8x8xf32>
    %77 = arith.subf %73, %76 : vector<8x8xf32>
    %78 = math.exp %77 : vector<8x8xf32>
    %cst_22 = arith.constant dense<0.000000e+00> : vector<8xf32>
    %79 = vector.multi_reduction <add>, %78, %cst_22 [1] : vector<8x8xf32> to vector<8xf32>
    %80 = vector.shape_cast %79 : vector<8xf32> to vector<8x1xf32>
    %81 = tpu.reciprocal %80 {approx = true} : vector<8x1xf32> -> vector<8x1xf32>
    %82 = vector.broadcast %81 : vector<8x1xf32> to vector<8x8xf32>
    %83 = arith.mulf %78, %82 : vector<8x8xf32>
    %84 = arith.truncf %83 : vector<8x8xf32> to vector<8x8xbf16>
    %cst_23 = arith.constant dense<0.000000e+00> : vector<8x8xf32>
    %85 = tpu.matmul %84, %71, %cst_23 {dimension_numbers = #tpu.dot_dimension_numbers<[1], [0], [0], [1], [0, 0, 1, 1], [], []>} : vector<8x8xbf16>, vector<8x8xbf16>, vector<8x8xf32> -> vector<8x8xf32>
    %86 = arith.truncf %85 : vector<8x8xf32> to vector<8x8xbf16>
    %87 = tpu.concatenate %32, %50, %68, %86 in 1 : vector<8x8xbf16>, vector<8x8xbf16>, vector<8x8xbf16>, vector<8x8xbf16> -> vector<8x32xbf16>
    %c0_24 = arith.constant 0 : index
    %c0_25 = arith.constant 0 : index
    %88 = vector.load %arg4[%c0_24, %c0_25] : memref<32x32xbf16, #tpu.memory_space<vmem>>, vector<32x32xbf16>
    %cst_26 = arith.constant dense<0.000000e+00> : vector<8x32xf32>
    %89 = tpu.matmul %87, %88, %cst_26 {dimension_numbers = #tpu.dot_dimension_numbers<[1], [0], [0], [1], [0, 0, 1, 1], [], []>} : vector<8x32xbf16>, vector<32x32xbf16>, vector<8x32xf32> -> vector<8x32xf32>
    %c0_27 = arith.constant 0 : index
    %c0_28 = arith.constant 0 : index
    %90 = vector.load %arg5[%c0_27, %c0_28] : memref<1x32xf32, #tpu.memory_space<vmem>>, vector<1x32xf32>
    %91 = vector.broadcast %90 : vector<1x32xf32> to vector<8x32xf32>
    %92 = arith.addf %89, %91 : vector<8x32xf32>
    %93 = arith.addf %1, %92 : vector<8x32xf32>
    %c0_29 = arith.constant 0 : index
    %c0_30 = arith.constant 0 : index
    %94 = vector.load %arg6[%c0_29, %c0_30] : memref<1x32xf32, #tpu.memory_space<vmem>>, vector<1x32xf32>
    %c0_31 = arith.constant 0 : index
    %c0_32 = arith.constant 0 : index
    %95 = vector.load %arg7[%c0_31, %c0_32] : memref<1x32xf32, #tpu.memory_space<vmem>>, vector<1x32xf32>
    %cst_33 = arith.constant dense<0.000000e+00> : vector<8xf32>
    %96 = vector.multi_reduction <add>, %93, %cst_33 [1] : vector<8x32xf32> to vector<8xf32>
    %97 = vector.shape_cast %96 : vector<8xf32> to vector<8x1xf32>
    %cst_34 = arith.constant 3.200000e+01 : f32
    %98 = vector.broadcast %cst_34 : f32 to vector<8x1xf32>
    %99 = arith.divf %97, %98 : vector<8x1xf32>
    %100 = vector.broadcast %99 : vector<8x1xf32> to vector<8x32xf32>
    %101 = arith.subf %93, %100 : vector<8x32xf32>
    %102 = arith.mulf %101, %101 : vector<8x32xf32>
    %cst_35 = arith.constant dense<0.000000e+00> : vector<8xf32>
    %103 = vector.multi_reduction <add>, %102, %cst_35 [1] : vector<8x32xf32> to vector<8xf32>
    %104 = vector.shape_cast %103 : vector<8xf32> to vector<8x1xf32>
    %cst_36 = arith.constant 3.200000e+01 : f32
    %105 = vector.broadcast %cst_36 : f32 to vector<8x1xf32>
    %106 = arith.divf %104, %105 : vector<8x1xf32>
    %cst_37 = arith.constant 9.99999974E-6 : f32
    %107 = vector.broadcast %cst_37 : f32 to vector<8x1xf32>
    %108 = arith.addf %106, %107 : vector<8x1xf32>
    %109 = math.rsqrt %108 : vector<8x1xf32>
    %110 = vector.broadcast %109 : vector<8x1xf32> to vector<8x32xf32>
    %111 = arith.mulf %101, %110 : vector<8x32xf32>
    %112 = vector.broadcast %94 : vector<1x32xf32> to vector<8x32xf32>
    %113 = arith.mulf %111, %112 : vector<8x32xf32>
    %114 = vector.broadcast %95 : vector<1x32xf32> to vector<8x32xf32>
    %115 = arith.addf %113, %114 : vector<8x32xf32>
    %116 = arith.truncf %115 : vector<8x32xf32> to vector<8x32xbf16>
    %c0_38 = arith.constant 0 : index
    %c0_39 = arith.constant 0 : index
    %117 = vector.load %arg8[%c0_38, %c0_39] : memref<32x64xbf16, #tpu.memory_space<vmem>>, vector<32x64xbf16>
    %cst_40 = arith.constant dense<0.000000e+00> : vector<8x64xf32>
    %118 = tpu.matmul %116, %117, %cst_40 {dimension_numbers = #tpu.dot_dimension_numbers<[1], [0], [0], [1], [0, 0, 1, 1], [], []>} : vector<8x32xbf16>, vector<32x64xbf16>, vector<8x64xf32> -> vector<8x64xf32>
    %c0_41 = arith.constant 0 : index
    %c0_42 = arith.constant 0 : index
    %119 = vector.load %arg9[%c0_41, %c0_42] : memref<1x64xf32, #tpu.memory_space<vmem>>, vector<1x64xf32>
    %120 = vector.broadcast %119 : vector<1x64xf32> to vector<8x64xf32>
    %121 = arith.addf %118, %120 : vector<8x64xf32>
    %cst_43 = arith.constant 0.000000e+00 : f32
    %122 = vector.broadcast %cst_43 : f32 to vector<8x64xf32>
    %123 = arith.maximumf %121, %122 : vector<8x64xf32>
    %124 = arith.truncf %123 : vector<8x64xf32> to vector<8x64xbf16>
    %c0_44 = arith.constant 0 : index
    %c0_45 = arith.constant 0 : index
    %125 = vector.load %arg10[%c0_44, %c0_45] : memref<64x32xbf16, #tpu.memory_space<vmem>>, vector<64x32xbf16>
    %cst_46 = arith.constant dense<0.000000e+00> : vector<8x32xf32>
    %126 = tpu.matmul %124, %125, %cst_46 {dimension_numbers = #tpu.dot_dimension_numbers<[1], [0], [0], [1], [0, 0, 1, 1], [], []>} : vector<8x64xbf16>, vector<64x32xbf16>, vector<8x32xf32> -> vector<8x32xf32>
    %c0_47 = arith.constant 0 : index
    %c0_48 = arith.constant 0 : index
    %127 = vector.load %arg11[%c0_47, %c0_48] : memref<1x32xf32, #tpu.memory_space<vmem>>, vector<1x32xf32>
    %128 = vector.broadcast %127 : vector<1x32xf32> to vector<8x32xf32>
    %129 = arith.addf %126, %128 : vector<8x32xf32>
    %130 = arith.addf %115, %129 : vector<8x32xf32>
    %c0_49 = arith.constant 0 : index
    %c0_50 = arith.constant 0 : index
    %131 = vector.load %arg12[%c0_49, %c0_50] : memref<1x32xf32, #tpu.memory_space<vmem>>, vector<1x32xf32>
    %c0_51 = arith.constant 0 : index
    %c0_52 = arith.constant 0 : index
    %132 = vector.load %arg13[%c0_51, %c0_52] : memref<1x32xf32, #tpu.memory_space<vmem>>, vector<1x32xf32>
    %cst_53 = arith.constant dense<0.000000e+00> : vector<8xf32>
    %133 = vector.multi_reduction <add>, %130, %cst_53 [1] : vector<8x32xf32> to vector<8xf32>
    %134 = vector.shape_cast %133 : vector<8xf32> to vector<8x1xf32>
    %cst_54 = arith.constant 3.200000e+01 : f32
    %135 = vector.broadcast %cst_54 : f32 to vector<8x1xf32>
    %136 = arith.divf %134, %135 : vector<8x1xf32>
    %137 = vector.broadcast %136 : vector<8x1xf32> to vector<8x32xf32>
    %138 = arith.subf %130, %137 : vector<8x32xf32>
    %139 = arith.mulf %138, %138 : vector<8x32xf32>
    %cst_55 = arith.constant dense<0.000000e+00> : vector<8xf32>
    %140 = vector.multi_reduction <add>, %139, %cst_55 [1] : vector<8x32xf32> to vector<8xf32>
    %141 = vector.shape_cast %140 : vector<8xf32> to vector<8x1xf32>
    %cst_56 = arith.constant 3.200000e+01 : f32
    %142 = vector.broadcast %cst_56 : f32 to vector<8x1xf32>
    %143 = arith.divf %141, %142 : vector<8x1xf32>
    %cst_57 = arith.constant 9.99999974E-6 : f32
    %144 = vector.broadcast %cst_57 : f32 to vector<8x1xf32>
    %145 = arith.addf %143, %144 : vector<8x1xf32>
    %146 = math.rsqrt %145 : vector<8x1xf32>
    %147 = vector.broadcast %146 : vector<8x1xf32> to vector<8x32xf32>
    %148 = arith.mulf %138, %147 : vector<8x32xf32>
    %149 = vector.broadcast %131 : vector<1x32xf32> to vector<8x32xf32>
    %150 = arith.mulf %148, %149 : vector<8x32xf32>
    %151 = vector.broadcast %132 : vector<1x32xf32> to vector<8x32xf32>
    %152 = arith.addf %150, %151 : vector<8x32xf32>
    %c0_58 = arith.constant 0 : index
    %c0_59 = arith.constant 0 : index
    %c0_60 = arith.constant 0 : index
    %153 = vector.load %arg14[%c0_58, %c0_59, %c0_60] : memref<1x8x32xf32, #tpu.memory_space<vmem>>, vector<1x8x32xf32>
    %154 = vector.shape_cast %153 : vector<1x8x32xf32> to vector<8x32xf32>
    %155 = vector.shape_cast %152 : vector<8x32xf32> to vector<1x8x32xf32>
    tpu.vector_store %arg14[%c0_58, %c0_59, %c0_60], %155 {strides = array<i32>} : memref<1x8x32xf32, #tpu.memory_space<vmem>>, vector<1x8x32xf32>,
    return
  }
  func.func @transform_0(%arg0: i32) -> (i32, i32, i32) {
    %c0_i32 = arith.constant 0 : i32
    %c0_i32_0 = arith.constant 0 : i32
    %c0_i32_1 = arith.constant 0 : i32
    return %arg0, %c0_i32, %c0_i32_0 : i32, i32, i32
  }
  func.func @transform_1(%arg0: i32) -> (i32, i32) {
    %c0_i32 = arith.constant 0 : i32
    %c0_i32_0 = arith.constant 0 : i32
    %c0_i32_1 = arith.constant 0 : i32
    return %c0_i32, %c0_i32_0 : i32, i32
  }
  func.func @transform_2(%arg0: i32) -> (i32, i32) {
    %c0_i32 = arith.constant 0 : i32
    %c0_i32_0 = arith.constant 0 : i32
    %c0_i32_1 = arith.constant 0 : i32
    return %c0_i32, %c0_i32_0 : i32, i32
  }
  func.func @transform_3(%arg0: i32) -> (i32, i32) {
    %c0_i32 = arith.constant 0 : i32
    %c0_i32_0 = arith.constant 0 : i32
    %c0_i32_1 = arith.constant 0 : i32
    return %c0_i32, %c0_i32_0 : i32, i32
  }
  func.func @transform_4(%arg0: i32) -> (i32, i32) {
    %c0_i32 = arith.constant 0 : i32
    %c0_i32_0 = arith.constant 0 : i32
    %c0_i32_1 = arith.constant 0 : i32
    return %c0_i32, %c0_i32_0 : i32, i32
  }
  func.func @transform_5(%arg0: i32) -> (i32, i32) {
    %c0_i32 = arith.constant 0 : i32
    %c0_i32_0 = arith.constant 0 : i32
    %c0_i32_1 = arith.constant 0 : i32
    return %c0_i32, %c0_i32_0 : i32, i32
  }
  func.func @transform_6(%arg0: i32) -> (i32, i32) {
    %c0_i32 = arith.constant 0 : i32
    %c0_i32_0 = arith.constant 0 : i32
    %c0_i32_1 = arith.constant 0 : i32
    return %c0_i32, %c0_i32_0 : i32, i32
  }
  func.func @transform_7(%arg0: i32) -> (i32, i32) {
    %c0_i32 = arith.constant 0 : i32
    %c0_i32_0 = arith.constant 0 : i32
    %c0_i32_1 = arith.constant 0 : i32
    return %c0_i32, %c0_i32_0 : i32, i32
  }
  func.func @transform_8(%arg0: i32) -> (i32, i32) {
    %c0_i32 = arith.constant 0 : i32
    %c0_i32_0 = arith.constant 0 : i32
    %c0_i32_1 = arith.constant 0 : i32
    return %c0_i32, %c0_i32_0 : i32, i32
  }
  func.func @transform_9(%arg0: i32) -> (i32, i32) {
    %c0_i32 = arith.constant 0 : i32
    %c0_i32_0 = arith.constant 0 : i32
    %c0_i32_1 = arith.constant 0 : i32
    return %c0_i32, %c0_i32_0 : i32, i32
  }
  func.func @transform_10(%arg0: i32) -> (i32, i32) {
    %c0_i32 = arith.constant 0 : i32
    %c0_i32_0 = arith.constant 0 : i32
    %c0_i32_1 = arith.constant 0 : i32
    return %c0_i32, %c0_i32_0 : i32, i32
  }
  func.func @transform_11(%arg0: i32) -> (i32, i32) {
    %c0_i32 = arith.constant 0 : i32
    %c0_i32_0 = arith.constant 0 : i32
    %c0_i32_1 = arith.constant 0 : i32
    return %c0_i32, %c0_i32_0 : i32, i32
  }
  func.func @transform_12(%arg0: i32) -> (i32, i32) {
    %c0_i32 = arith.constant 0 : i32
    %c0_i32_0 = arith.constant 0 : i32
    %c0_i32_1 = arith.constant 0 : i32
    return %c0_i32, %c0_i32_0 : i32, i32
  }
  func.func @transform_13(%arg0: i32) -> (i32, i32, i32) {
    %c0_i32 = arith.constant 0 : i32
    %c0_i32_0 = arith.constant 0 : i32
    %c0_i32_1 = arith.constant 0 : i32
    return %arg0, %c0_i32, %c0_i32_0 : i32, i32, i32
  }
}

module attributes {stable_mosaic.version = 11 : i64} {
  func.func @_kernel_causal(%arg0: i32, %arg1: memref<1x8x32xf32, #tpu.memory_space<vmem>>, %arg2: memref<32x96xbf16, #tpu.memory_space<vmem>>, %arg3: memref<1x96xf32, #tpu.memory_space<vmem>>, %arg4: memref<32x32xbf16, #tpu.memory_space<vmem>>, %arg5: memref<1x32xf32, #tpu.memory_space<vmem>>, %arg6: memref<1x32xf32, #tpu.memory_space<vmem>>, %arg7: memref<1x32xf32, #tpu.memory_space<vmem>>, %arg8: memref<32x64xbf16, #tpu.memory_space<vmem>>, %arg9: memref<1x64xf32, #tpu.memory_space<vmem>>, %arg10: memref<64x32xbf16, #tpu.memory_space<vmem>>, %arg11: memref<1x32xf32, #tpu.memory_space<vmem>>, %arg12: memref<1x32xf32, #tpu.memory_space<vmem>>, %arg13: memref<1x32xf32, #tpu.memory_space<vmem>>, %arg14: memref<1x8x32xf32, #tpu.memory_space<vmem>>) attributes {dimension_semantics = [#tpu.dimension_semantics<parallel>], iteration_bounds = array<i64: 2>, scalar_prefetch = 0 : i64, scratch_operands = 0 : i64, tpu.core_type = #tpu.core_type<tc>, window_params = [{transform_indices = @transform_0, window_bounds = array<i64: 1, 8, 32>}, {pipeline_mode = #tpu.pipeline_mode<synchronous>, transform_indices = @transform_1, window_bounds = array<i64: 32, 96>}, {pipeline_mode = #tpu.pipeline_mode<synchronous>, transform_indices = @transform_2, window_bounds = array<i64: 1, 96>}, {pipeline_mode = #tpu.pipeline_mode<synchronous>, transform_indices = @transform_3, window_bounds = array<i64: 32, 32>}, {pipeline_mode = #tpu.pipeline_mode<synchronous>, transform_indices = @transform_4, window_bounds = array<i64: 1, 32>}, {pipeline_mode = #tpu.pipeline_mode<synchronous>, transform_indices = @transform_5, window_bounds = array<i64: 1, 32>}, {pipeline_mode = #tpu.pipeline_mode<synchronous>, transform_indices = @transform_6, window_bounds = array<i64: 1, 32>}, {pipeline_mode = #tpu.pipeline_mode<synchronous>, transform_indices = @transform_7, window_bounds = array<i64: 32, 64>}, {pipeline_mode = #tpu.pipeline_mode<synchronous>, transform_indices = @transform_8, window_bounds = array<i64: 1, 64>}, {pipeline_mode = #tpu.pipeline_mode<synchronous>, transform_indices = @transform_9, window_bounds = array<i64: 64, 32>}, {pipeline_mode = #tpu.pipeline_mode<synchronous>, transform_indices = @transform_10, window_bounds = array<i64: 1, 32>}, {pipeline_mode = #tpu.pipeline_mode<synchronous>, transform_indices = @transform_11, window_bounds = array<i64: 1, 32>}, {pipeline_mode = #tpu.pipeline_mode<synchronous>, transform_indices = @transform_12, window_bounds = array<i64: 1, 32>}, {transform_indices = @transform_13, window_bounds = array<i64: 1, 8, 32>}]} {
    %c0 = arith.constant 0 : index
    %c0_0 = arith.constant 0 : index
    %c0_1 = arith.constant 0 : index
    %0 = vector.load %arg1[%c0, %c0_0, %c0_1] : memref<1x8x32xf32, #tpu.memory_space<vmem>>, vector<1x8x32xf32>
    %1 = vector.shape_cast %0 : vector<1x8x32xf32> to vector<8x32xf32>
    %2 = arith.truncf %1 : vector<8x32xf32> to vector<8x32xbf16>
    %3 = tpu.iota {dimensions = array<i32: 0>} : vector<8x8xi32>
    %4 = tpu.iota {dimensions = array<i32: 1>} : vector<8x8xi32>
    %5 = arith.cmpi sgt, %4, %3 : vector<8x8xi32>
    %cst = arith.constant -1.000000e+09 : f32
    %cst_2 = arith.constant 0.000000e+00 : f32
    %6 = vector.broadcast %cst : f32 to vector<8x8xf32>
    %7 = vector.broadcast %cst_2 : f32 to vector<8x8xf32>
    %8 = arith.select %5, %6, %7 : vector<8x8xi1>, vector<8x8xf32>
    %c0_3 = arith.constant 0 : index
    %c0_4 = arith.constant 0 : index
    %9 = vector.load %arg2[%c0_3, %c0_4] : memref<32x96xbf16, #tpu.memory_space<vmem>>, vector<32x96xbf16>
    %cst_5 = arith.constant dense<0.000000e+00> : vector<8x96xf32>
    %10 = tpu.matmul %2, %9, %cst_5 {dimension_numbers = #tpu.dot_dimension_numbers<[1], [0], [0], [1], [0, 0, 1, 1], [], []>} : vector<8x32xbf16>, vector<32x96xbf16>, vector<8x96xf32> -> vector<8x96xf32>
    %c0_6 = arith.constant 0 : index
    %c0_7 = arith.constant 0 : index
    %11 = vector.load %arg3[%c0_6, %c0_7] : memref<1x96xf32, #tpu.memory_space<vmem>>, vector<1x96xf32>
    %12 = vector.broadcast %11 : vector<1x96xf32> to vector<8x96xf32>
    %13 = arith.addf %10, %12 : vector<8x96xf32>
    %14 = arith.truncf %13 : vector<8x96xf32> to vector<8x96xbf16>
    %15 = vector.extract_strided_slice %14 {offsets = [0, 0], sizes = [8, 8], strides = [1, 1]} : vector<8x96xbf16> to vector<8x8xbf16>
    %16 = vector.extract_strided_slice %14 {offsets = [0, 32], sizes = [8, 8], strides = [1, 1]} : vector<8x96xbf16> to vector<8x8xbf16>
    %17 = vector.extract_strided_slice %14 {offsets = [0, 64], sizes = [8, 8], strides = [1, 1]} : vector<8x96xbf16> to vector<8x8xbf16>
    %cst_8 = arith.constant dense<0.000000e+00> : vector<8x8xf32>
    %18 = tpu.matmul %15, %16, %cst_8 {dimension_numbers = #tpu.dot_dimension_numbers<[1], [1], [0], [0], [0, 0, 1, 0], [], []>} : vector<8x8xbf16>, vector<8x8xbf16>, vector<8x8xf32> -> vector<8x8xf32>
    %19 = arith.addf %18, %8 : vector<8x8xf32>
    %cst_9 = arith.constant dense<0xFF800000> : vector<8xf32>
    %20 = vector.multi_reduction <maximumf>, %19, %cst_9 [1] : vector<8x8xf32> to vector<8xf32>
    %21 = vector.shape_cast %20 : vector<8xf32> to vector<8x1xf32>
    %22 = vector.broadcast %21 : vector<8x1xf32> to vector<8x8xf32>
    %23 = arith.subf %19, %22 : vector<8x8xf32>
    %24 = math.exp %23 : vector<8x8xf32>
    %cst_10 = arith.constant dense<0.000000e+00> : vector<8xf32>
    %25 = vector.multi_reduction <add>, %24, %cst_10 [1] : vector<8x8xf32> to vector<8xf32>
    %26 = vector.shape_cast %25 : vector<8xf32> to vector<8x1xf32>
    %27 = tpu.reciprocal %26 {approx = true} : vector<8x1xf32> -> vector<8x1xf32>
    %28 = vector.broadcast %27 : vector<8x1xf32> to vector<8x8xf32>
    %29 = arith.mulf %24, %28 : vector<8x8xf32>
    %30 = arith.truncf %29 : vector<8x8xf32> to vector<8x8xbf16>
    %cst_11 = arith.constant dense<0.000000e+00> : vector<8x8xf32>
    %31 = tpu.matmul %30, %17, %cst_11 {dimension_numbers = #tpu.dot_dimension_numbers<[1], [0], [0], [1], [0, 0, 1, 1], [], []>} : vector<8x8xbf16>, vector<8x8xbf16>, vector<8x8xf32> -> vector<8x8xf32>
    %32 = arith.truncf %31 : vector<8x8xf32> to vector<8x8xbf16>
    %33 = vector.extract_strided_slice %14 {offsets = [0, 8], sizes = [8, 8], strides = [1, 1]} : vector<8x96xbf16> to vector<8x8xbf16>
    %34 = vector.extract_strided_slice %14 {offsets = [0, 40], sizes = [8, 8], strides = [1, 1]} : vector<8x96xbf16> to vector<8x8xbf16>
    %35 = vector.extract_strided_slice %14 {offsets = [0, 72], sizes = [8, 8], strides = [1, 1]} : vector<8x96xbf16> to vector<8x8xbf16>
    %cst_12 = arith.constant dense<0.000000e+00> : vector<8x8xf32>
    %36 = tpu.matmul %33, %34, %cst_12 {dimension_numbers = #tpu.dot_dimension_numbers<[1], [1], [0], [0], [0, 0, 1, 0], [], []>} : vector<8x8xbf16>, vector<8x8xbf16>, vector<8x8xf32> -> vector<8x8xf32>
    %37 = arith.addf %36, %8 : vector<8x8xf32>
    %cst_13 = arith.constant dense<0xFF800000> : vector<8xf32>
    %38 = vector.multi_reduction <maximumf>, %37, %cst_13 [1] : vector<8x8xf32> to vector<8xf32>
    %39 = vector.shape_cast %38 : vector<8xf32> to vector<8x1xf32>
    %40 = vector.broadcast %39 : vector<8x1xf32> to vector<8x8xf32>
    %41 = arith.subf %37, %40 : vector<8x8xf32>
    %42 = math.exp %41 : vector<8x8xf32>
    %cst_14 = arith.constant dense<0.000000e+00> : vector<8xf32>
    %43 = vector.multi_reduction <add>, %42, %cst_14 [1] : vector<8x8xf32> to vector<8xf32>
    %44 = vector.shape_cast %43 : vector<8xf32> to vector<8x1xf32>
    %45 = tpu.reciprocal %44 {approx = true} : vector<8x1xf32> -> vector<8x1xf32>
    %46 = vector.broadcast %45 : vector<8x1xf32> to vector<8x8xf32>
    %47 = arith.mulf %42, %46 : vector<8x8xf32>
    %48 = arith.truncf %47 : vector<8x8xf32> to vector<8x8xbf16>
    %cst_15 = arith.constant dense<0.000000e+00> : vector<8x8xf32>
    %49 = tpu.matmul %48, %35, %cst_15 {dimension_numbers = #tpu.dot_dimension_numbers<[1], [0], [0], [1], [0, 0, 1, 1], [], []>} : vector<8x8xbf16>, vector<8x8xbf16>, vector<8x8xf32> -> vector<8x8xf32>
    %50 = arith.truncf %49 : vector<8x8xf32> to vector<8x8xbf16>
    %51 = vector.extract_strided_slice %14 {offsets = [0, 16], sizes = [8, 8], strides = [1, 1]} : vector<8x96xbf16> to vector<8x8xbf16>
    %52 = vector.extract_strided_slice %14 {offsets = [0, 48], sizes = [8, 8], strides = [1, 1]} : vector<8x96xbf16> to vector<8x8xbf16>
    %53 = vector.extract_strided_slice %14 {offsets = [0, 80], sizes = [8, 8], strides = [1, 1]} : vector<8x96xbf16> to vector<8x8xbf16>
    %cst_16 = arith.constant dense<0.000000e+00> : vector<8x8xf32>
    %54 = tpu.matmul %51, %52, %cst_16 {dimension_numbers = #tpu.dot_dimension_numbers<[1], [1], [0], [0], [0, 0, 1, 0], [], []>} : vector<8x8xbf16>, vector<8x8xbf16>, vector<8x8xf32> -> vector<8x8xf32>
    %55 = arith.addf %54, %8 : vector<8x8xf32>
    %cst_17 = arith.constant dense<0xFF800000> : vector<8xf32>
    %56 = vector.multi_reduction <maximumf>, %55, %cst_17 [1] : vector<8x8xf32> to vector<8xf32>
    %57 = vector.shape_cast %56 : vector<8xf32> to vector<8x1xf32>
    %58 = vector.broadcast %57 : vector<8x1xf32> to vector<8x8xf32>
    %59 = arith.subf %55, %58 : vector<8x8xf32>
    %60 = math.exp %59 : vector<8x8xf32>
    %cst_18 = arith.constant dense<0.000000e+00> : vector<8xf32>
    %61 = vector.multi_reduction <add>, %60, %cst_18 [1] : vector<8x8xf32> to vector<8xf32>
    %62 = vector.shape_cast %61 : vector<8xf32> to vector<8x1xf32>
    %63 = tpu.reciprocal %62 {approx = true} : vector<8x1xf32> -> vector<8x1xf32>
    %64 = vector.broadcast %63 : vector<8x1xf32> to vector<8x8xf32>
    %65 = arith.mulf %60, %64 : vector<8x8xf32>
    %66 = arith.truncf %65 : vector<8x8xf32> to vector<8x8xbf16>
    %cst_19 = arith.constant dense<0.000000e+00> : vector<8x8xf32>
    %67 = tpu.matmul %66, %53, %cst_19 {dimension_numbers = #tpu.dot_dimension_numbers<[1], [0], [0], [1], [0, 0, 1, 1], [], []>} : vector<8x8xbf16>, vector<8x8xbf16>, vector<8x8xf32> -> vector<8x8xf32>
    %68 = arith.truncf %67 : vector<8x8xf32> to vector<8x8xbf16>
    %69 = vector.extract_strided_slice %14 {offsets = [0, 24], sizes = [8, 8], strides = [1, 1]} : vector<8x96xbf16> to vector<8x8xbf16>
    %70 = vector.extract_strided_slice %14 {offsets = [0, 56], sizes = [8, 8], strides = [1, 1]} : vector<8x96xbf16> to vector<8x8xbf16>
    %71 = vector.extract_strided_slice %14 {offsets = [0, 88], sizes = [8, 8], strides = [1, 1]} : vector<8x96xbf16> to vector<8x8xbf16>
    %cst_20 = arith.constant dense<0.000000e+00> : vector<8x8xf32>
    %72 = tpu.matmul %69, %70, %cst_20 {dimension_numbers = #tpu.dot_dimension_numbers<[1], [1], [0], [0], [0, 0, 1, 0], [], []>} : vector<8x8xbf16>, vector<8x8xbf16>, vector<8x8xf32> -> vector<8x8xf32>
    %73 = arith.addf %72, %8 : vector<8x8xf32>
    %cst_21 = arith.constant dense<0xFF800000> : vector<8xf32>
    %74 = vector.multi_reduction <maximumf>, %73, %cst_21 [1] : vector<8x8xf32> to vector<8xf32>
    %75 = vector.shape_cast %74 : vector<8xf32> to vector<8x1xf32>
    %76 = vector.broadcast %75 : vector<8x1xf32> to vector<8x8xf32>
    %77 = arith.subf %73, %76 : vector<8x8xf32>
    %78 = math.exp %77 : vector<8x8xf32>
    %cst_22 = arith.constant dense<0.000000e+00> : vector<8xf32>
    %79 = vector.multi_reduction <add>, %78, %cst_22 [1] : vector<8x8xf32> to vector<8xf32>
    %80 = vector.shape_cast %79 : vector<8xf32> to vector<8x1xf32>
    %81 = tpu.reciprocal %80 {approx = true} : vector<8x1xf32> -> vector<8x1xf32>
    %82 = vector.broadcast %81 : vector<8x1xf32> to vector<8x8xf32>
    %83 = arith.mulf %78, %82 : vector<8x8xf32>
    %84 = arith.truncf %83 : vector<8x8xf32> to vector<8x8xbf16>
    %cst_23 = arith.constant dense<0.000000e+00> : vector<8x8xf32>
    %85 = tpu.matmul %84, %71, %cst_23 {dimension_numbers = #tpu.dot_dimension_numbers<[1], [0], [0], [1], [0, 0, 1, 1], [], []>} : vector<8x8xbf16>, vector<8x8xbf16>, vector<8x8xf32> -> vector<8x8xf32>
    %86 = arith.truncf %85 : vector<8x8xf32> to vector<8x8xbf16>
    %87 = tpu.concatenate %32, %50, %68, %86 in 1 : vector<8x8xbf16>, vector<8x8xbf16>, vector<8x8xbf16>, vector<8x8xbf16> -> vector<8x32xbf16>
    %c0_24 = arith.constant 0 : index
    %c0_25 = arith.constant 0 : index
    %88 = vector.load %arg4[%c0_24, %c0_25] : memref<32x32xbf16, #tpu.memory_space<vmem>>, vector<32x32xbf16>
    %cst_26 = arith.constant dense<0.000000e+00> : vector<8x32xf32>
    %89 = tpu.matmul %87, %88, %cst_26 {dimension_numbers = #tpu.dot_dimension_numbers<[1], [0], [0], [1], [0, 0, 1, 1], [], []>} : vector<8x32xbf16>, vector<32x32xbf16>, vector<8x32xf32> -> vector<8x32xf32>
    %c0_27 = arith.constant 0 : index
    %c0_28 = arith.constant 0 : index
    %90 = vector.load %arg5[%c0_27, %c0_28] : memref<1x32xf32, #tpu.memory_space<vmem>>, vector<1x32xf32>
    %91 = vector.broadcast %90 : vector<1x32xf32> to vector<8x32xf32>
    %92 = arith.addf %89, %91 : vector<8x32xf32>
    %93 = arith.addf %1, %92 : vector<8x32xf32>
    %c0_29 = arith.constant 0 : index
    %c0_30 = arith.constant 0 : index
    %94 = vector.load %arg6[%c0_29, %c0_30] : memref<1x32xf32, #tpu.memory_space<vmem>>, vector<1x32xf32>
    %c0_31 = arith.constant 0 : index
    %c0_32 = arith.constant 0 : index
    %95 = vector.load %arg7[%c0_31, %c0_32] : memref<1x32xf32, #tpu.memory_space<vmem>>, vector<1x32xf32>
    %cst_33 = arith.constant dense<0.000000e+00> : vector<8xf32>
    %96 = vector.multi_reduction <add>, %93, %cst_33 [1] : vector<8x32xf32> to vector<8xf32>
    %97 = vector.shape_cast %96 : vector<8xf32> to vector<8x1xf32>
    %cst_34 = arith.constant 3.200000e+01 : f32
    %98 = vector.broadcast %cst_34 : f32 to vector<8x1xf32>
    %99 = arith.divf %97, %98 : vector<8x1xf32>
    %100 = vector.broadcast %99 : vector<8x1xf32> to vector<8x32xf32>
    %101 = arith.subf %93, %100 : vector<8x32xf32>
    %102 = arith.mulf %101, %101 : vector<8x32xf32>
    %cst_35 = arith.constant dense<0.000000e+00> : vector<8xf32>
    %103 = vector.multi_reduction <add>, %102, %cst_35 [1] : vector<8x32xf32> to vector<8xf32>
    %104 = vector.shape_cast %103 : vector<8xf32> to vector<8x1xf32>
    %cst_36 = arith.constant 3.200000e+01 : f32
    %105 = vector.broadcast %cst_36 : f32 to vector<8x1xf32>
    %106 = arith.divf %104, %105 : vector<8x1xf32>
    %cst_37 = arith.constant 9.99999974E-6 : f32
    %107 = vector.broadcast %cst_37 : f32 to vector<8x1xf32>
    %108 = arith.addf %106, %107 : vector<8x1xf32>
    %109 = math.rsqrt %108 : vector<8x1xf32>
    %110 = vector.broadcast %109 : vector<8x1xf32> to vector<8x32xf32>
    %111 = arith.mulf %101, %110 : vector<8x32xf32>
    %112 = vector.broadcast %94 : vector<1x32xf32> to vector<8x32xf32>
    %113 = arith.mulf %111, %112 : vector<8x32xf32>
    %114 = vector.broadcast %95 : vector<1x32xf32> to vector<8x32xf32>
    %115 = arith.addf %113, %114 : vector<8x32xf32>
    %116 = arith.truncf %115 : vector<8x32xf32> to vector<8x32xbf16>
    %c0_38 = arith.constant 0 : index
    %c0_39 = arith.constant 0 : index
    %117 = vector.load %arg8[%c0_38, %c0_39] : memref<32x64xbf16, #tpu.memory_space<vmem>>, vector<32x64xbf16>
    %cst_40 = arith.constant dense<0.000000e+00> : vector<8x64xf32>
    %118 = tpu.matmul %116, %117, %cst_40 {dimension_numbers = #tpu.dot_dimension_numbers<[1], [0], [0], [1], [0, 0, 1, 1], [], []>} : vector<8x32xbf16>, vector<32x64xbf16>, vector<8x64xf32> -> vector<8x64xf32>
    %c0_41 = arith.constant 0 : index
    %c0_42 = arith.constant 0 : index
    %119 = vector.load %arg9[%c0_41, %c0_42] : memref<1x64xf32, #tpu.memory_space<vmem>>, vector<1x64xf32>
    %120 = vector.broadcast %119 : vector<1x64xf32> to vector<8x64xf32>
    %121 = arith.addf %118, %120 : vector<8x64xf32>
    %cst_43 = arith.constant 0.000000e+00 : f32
    %122 = vector.broadcast %cst_43 : f32 to vector<8x64xf32>
    %123 = arith.maximumf %121, %122 : vector<8x64xf32>
    %124 = arith.truncf %123 : vector<8x64xf32> to vector<8x64xbf16>
    %c0_44 = arith.constant 0 : index
    %c0_45 = arith.constant 0 : index
    %125 = vector.load %arg10[%c0_44, %c0_45] : memref<64x32xbf16, #tpu.memory_space<vmem>>, vector<64x32xbf16>
    %cst_46 = arith.constant dense<0.000000e+00> : vector<8x32xf32>
    %126 = tpu.matmul %124, %125, %cst_46 {dimension_numbers = #tpu.dot_dimension_numbers<[1], [0], [0], [1], [0, 0, 1, 1], [], []>} : vector<8x64xbf16>, vector<64x32xbf16>, vector<8x32xf32> -> vector<8x32xf32>
    %c0_47 = arith.constant 0 : index
    %c0_48 = arith.constant 0 : index
    %127 = vector.load %arg11[%c0_47, %c0_48] : memref<1x32xf32, #tpu.memory_space<vmem>>, vector<1x32xf32>
    %128 = vector.broadcast %127 : vector<1x32xf32> to vector<8x32xf32>
    %129 = arith.addf %126, %128 : vector<8x32xf32>
    %130 = arith.addf %115, %129 : vector<8x32xf32>
    %c0_49 = arith.constant 0 : index
    %c0_50 = arith.constant 0 : index
    %131 = vector.load %arg12[%c0_49, %c0_50] : memref<1x32xf32, #tpu.memory_space<vmem>>, vector<1x32xf32>
    %c0_51 = arith.constant 0 : index
    %c0_52 = arith.constant 0 : index
    %132 = vector.load %arg13[%c0_51, %c0_52] : memref<1x32xf32, #tpu.memory_space<vmem>>, vector<1x32xf32>
    %cst_53 = arith.constant dense<0.000000e+00> : vector<8xf32>
    %133 = vector.multi_reduction <add>, %130, %cst_53 [1] : vector<8x32xf32> to vector<8xf32>
    %134 = vector.shape_cast %133 : vector<8xf32> to vector<8x1xf32>
    %cst_54 = arith.constant 3.200000e+01 : f32
    %135 = vector.broadcast %cst_54 : f32 to vector<8x1xf32>
    %136 = arith.divf %134, %135 : vector<8x1xf32>
    %137 = vector.broadcast %136 : vector<8x1xf32> to vector<8x32xf32>
    %138 = arith.subf %130, %137 : vector<8x32xf32>
    %139 = arith.mulf %138, %138 : vector<8x32xf32>
    %cst_55 = arith.constant dense<0.000000e+00> : vector<8xf32>
    %140 = vector.multi_reduction <add>, %139, %cst_55 [1] : vector<8x32xf32> to vector<8xf32>
    %141 = vector.shape_cast %140 : vector<8xf32> to vector<8x1xf32>
    %cst_56 = arith.constant 3.200000e+01 : f32
    %142 = vector.broadcast %cst_56 : f32 to vector<8x1xf32>
    %143 = arith.divf %141, %142 : vector<8x1xf32>
    %cst_57 = arith.constant 9.99999974E-6 : f32
    %144 = vector.broadcast %cst_57 : f32 to vector<8x1xf32>
    %145 = arith.addf %143, %144 : vector<8x1xf32>
    %146 = math.rsqrt %145 : vector<8x1xf32>
    %147 = vector.broadcast %146 : vector<8x1xf32> to vector<8x32xf32>
    %148 = arith.mulf %138, %147 : vector<8x32xf32>
    %149 = vector.broadcast %131 : vector<1x32xf32> to vector<8x32xf32>
    %150 = arith.mulf %148, %149 : vector<8x32xf32>
    %151 = vector.broadcast %132 : vector<1x32xf32> to vector<8x32xf32>
    %152 = arith.addf %150, %151 : vector<8x32xf32>
    %c0_58 = arith.constant 0 : index
    %c0_59 = arith.constant 0 : index
    %c0_60 = arith.constant 0 : index
    %153 = vector.load %arg14[%c0_58, %c0_59, %c0_60] : memref<1x8x32xf32, #tpu.memory_space<vmem>>, vector<1x8x32xf32>
    %154 = vector.shape_cast %153 : vector<1x8x32xf32> to vector<8x32xf32>
    %155 = vector.shape_cast %152 : vector<8x32xf32> to vector<1x8x32xf32>
    tpu.vector_store %arg14[%c0_58, %c0_59, %c0_60], %155 {strides = array<i32>} : memref<1x8x32xf32, #tpu.memory_space<vmem>>, vector<1x8x32xf32>,
    return
  }
  func.func @transform_0(%arg0: i32) -> (i32, i32, i32) {
    %c0_i32 = arith.constant 0 : i32
    %c0_i32_0 = arith.constant 0 : i32
    %c0_i32_1 = arith.constant 0 : i32
    return %arg0, %c0_i32, %c0_i32_0 : i32, i32, i32
  }
  func.func @transform_1(%arg0: i32) -> (i32, i32) {
    %c0_i32 = arith.constant 0 : i32
    %c0_i32_0 = arith.constant 0 : i32
    %c0_i32_1 = arith.constant 0 : i32
    return %c0_i32, %c0_i32_0 : i32, i32
  }
  func.func @transform_2(%arg0: i32) -> (i32, i32) {
    %c0_i32 = arith.constant 0 : i32
    %c0_i32_0 = arith.constant 0 : i32
    %c0_i32_1 = arith.constant 0 : i32
    return %c0_i32, %c0_i32_0 : i32, i32
  }
  func.func @transform_3(%arg0: i32) -> (i32, i32) {
    %c0_i32 = arith.constant 0 : i32
    %c0_i32_0 = arith.constant 0 : i32
    %c0_i32_1 = arith.constant 0 : i32
    return %c0_i32, %c0_i32_0 : i32, i32
  }
  func.func @transform_4(%arg0: i32) -> (i32, i32) {
    %c0_i32 = arith.constant 0 : i32
    %c0_i32_0 = arith.constant 0 : i32
    %c0_i32_1 = arith.constant 0 : i32
    return %c0_i32, %c0_i32_0 : i32, i32
  }
  func.func @transform_5(%arg0: i32) -> (i32, i32) {
    %c0_i32 = arith.constant 0 : i32
    %c0_i32_0 = arith.constant 0 : i32
    %c0_i32_1 = arith.constant 0 : i32
    return %c0_i32, %c0_i32_0 : i32, i32
  }
  func.func @transform_6(%arg0: i32) -> (i32, i32) {
    %c0_i32 = arith.constant 0 : i32
    %c0_i32_0 = arith.constant 0 : i32
    %c0_i32_1 = arith.constant 0 : i32
    return %c0_i32, %c0_i32_0 : i32, i32
  }
  func.func @transform_7(%arg0: i32) -> (i32, i32) {
    %c0_i32 = arith.constant 0 : i32
    %c0_i32_0 = arith.constant 0 : i32
    %c0_i32_1 = arith.constant 0 : i32
    return %c0_i32, %c0_i32_0 : i32, i32
  }
  func.func @transform_8(%arg0: i32) -> (i32, i32) {
    %c0_i32 = arith.constant 0 : i32
    %c0_i32_0 = arith.constant 0 : i32
    %c0_i32_1 = arith.constant 0 : i32
    return %c0_i32, %c0_i32_0 : i32, i32
  }
  func.func @transform_9(%arg0: i32) -> (i32, i32) {
    %c0_i32 = arith.constant 0 : i32
    %c0_i32_0 = arith.constant 0 : i32
    %c0_i32_1 = arith.constant 0 : i32
    return %c0_i32, %c0_i32_0 : i32, i32
  }
  func.func @transform_10(%arg0: i32) -> (i32, i32) {
    %c0_i32 = arith.constant 0 : i32
    %c0_i32_0 = arith.constant 0 : i32
    %c0_i32_1 = arith.constant 0 : i32
    return %c0_i32, %c0_i32_0 : i32, i32
  }
  func.func @transform_11(%arg0: i32) -> (i32, i32) {
    %c0_i32 = arith.constant 0 : i32
    %c0_i32_0 = arith.constant 0 : i32
    %c0_i32_1 = arith.constant 0 : i32
    return %c0_i32, %c0_i32_0 : i32, i32
  }
  func.func @transform_12(%arg0: i32) -> (i32, i32) {
    %c0_i32 = arith.constant 0 : i32
    %c0_i32_0 = arith.constant 0 : i32
    %c0_i32_1 = arith.constant 0 : i32
    return %c0_i32, %c0_i32_0 : i32, i32
  }
  func.func @transform_13(%arg0: i32) -> (i32, i32, i32) {
    %c0_i32 = arith.constant 0 : i32
    %c0_i32_0 = arith.constant 0 : i32
    %c0_i32_1 = arith.constant 0 : i32
    return %arg0, %c0_i32, %c0_i32_0 : i32, i32, i32
  }
}

</mosaic_0001>

<bundles_post_ra>
// kernel: tpu_custom_call.1
= control target key start
LH: loop header
LB: loop body
LE: loop exit
PB: predicated region body
PF: predicated region fallthrough
CT: control target
= control target key end

     0   :  { %s1596_s0 = inlined_call_operand.vmem [shape: f32[2,8,32], index: 0, kind: input, shape index: {}]   ;;  %s1597_s1 = inlined_call_operand.vmem [shape: bf16[32,96], index: 1, kind: input, shape index: {}]   ;;  %s1598_s2 = inlined_call_operand.vmem [shape: f32[1,96], index: 2, kind: input, shape index: {}]   ;;  %s1599_s3 = inlined_call_operand.vmem [shape: bf16[32,32], index: 3, kind: input, shape index: {}]   ;;  %s1600_s4 = inlined_call_operand.vmem [shape: f32[1,32], index: 4, kind: input, shape index: {}]   ;;  %s1601_s5 = inlined_call_operand.vmem [shape: f32[1,32], index: 5, kind: input, shape index: {}]   ;;  %s1602_s6 = inlined_call_operand.vmem [shape: f32[1,32], index: 6, kind: input, shape index: {}]   ;;  %s1603_s7 = inlined_call_operand.hbm [shape: bf16[32,64], index: 7, kind: input, shape index: {}]   ;;  %s1604_s8 = inlined_call_operand.vmem [shape: f32[1,64], index: 8, kind: input, shape index: {}]   ;;  %s1605_s9 = inlined_call_operand.vmem [shape: bf16[64,32], index: 9, kind: input, shape index: {}]   ;;  %s1606_s10 = inlined_call_operand.vmem [shape: f32[1,32], index: 10, kind: input, shape index: {}]   ;;  %s1607_s11 = inlined_call_operand.vmem [shape: f32[1,32], index: 11, kind: input, shape index: {}]   ;;  %s1608_s12 = inlined_call_operand.vmem [shape: f32[1,32], index: 12, kind: input, shape index: {}]   ;;  %s1609_s13 = inlined_call_operand.hbm [shape: f32[2,8,32], index: 13, kind: output, shape index: {}]  }
   0x1   :  { %1611 = sst [smem:[#allocation10_spill]] %s1596_s0 }
   0x2   :  { %1612 = sst [smem:[#allocation11_spill]] %s1603_s7 }
   0x3   :  { %18 = vsyncpa [#allocation3], 0 }
   0x4   :  { %19 = vsyncpa [#allocation4], 0 }
   0x5   :  { %21 = vsyncpa [#allocation4 + $0x1], 0  ;;  %s1402_s25 = smov 0   ;;  %s1404_s26 = smov 0  }
   0x6   :  { %s1406_s27 = smov 0   ;;  %s1408_s28 = smov 0  }
   0x7 LB: > { %1613 = sst [smem:[#allocation8_spill]] %s1307_s27  ;;  %s1423_s29 = sadd.s32 4294967295, %s1311_s28   ;;  %s1311_s28 = sphi %s1408_s28, %s1623_s28   ;;  %s1307_s27 = sphi %s1406_s27, %s1620_s27   ;;  %s1303_s26 = sphi %s1404_s26, %s1622_s26   ;;  %s1299_s25 = sphi %s1402_s25, %s1621_s25  }
   0x8   : > { %s1043_s30 = sadd.s32 4294967294, %s1311_s28   ;;  %s1427_s14 = sadd.s32 1, %s1311_s28  }
   0x9   : > { %s312_s15 = sadd.s32 1, %s1307_s27  ;;  %s309_s16 = ssub.s32 %s1311_s28, %s1427_s14 }
   0xa   : > { %p322_p0 = scmp.ne.s32.totalorder %s1307_s27, %s1303_s26  ;;  %p310_p1 = scmp.eq.s32.totalorder %s309_s16, 0 }
   0xb   : > { %p323_p2 = scmp.eq.s32.totalorder %s1423_s29, 1  ;;  %p328_p3 = scmp.ne.s32.totalorder %s1303_s26, %s1299_s25 }
   0xc   : > { %p329_p4 = scmp.eq.s32.totalorder %s1043_s30, 1  ;;  %p1044_p7 = scmp.ge.s32.totalorder %s1311_s28, 1 }
   0xd   : > { %s1438_s17 = scalar_select %p310_p1, %s1307_s27, %s312_s15  }
   0xe   : > { %p1440_p5 = por %p323_p2, %p322_p0  ;;  %p1444_p6 = por %p329_p4, %p328_p3 }
   0xf   : > { %1614 = sst [smem:[#allocation9_spill]] %s1438_s17  ;;  %p336_p8 = scmp.lt.s32.totalorder %s1311_s28, 3 }
  0x10   : > { %p1131_p9 = scmp.eq.s32.totalorder %s1423_s29, 0  ;;  %s1617_s7 = sld [smem:[#allocation11_spill]] }
  0x11   : > { %p337_p10 = pnand %p1044_p7, %p336_p8  ;;  %s1313_s23 = smov [#allocation2]  }
  0x12   : > { %s367_s24 = sshll.u32 %s1313_s23, 4  ;;  %s1314_s30 = smov 64   ;;  %s368_s24 = int_to_ptr.vmem [resolvable:$true] %s367_s24 }
  0x13   : > { %p1123_p11 = pneg %p337_p10  ;;  %s1315_s15 = smov 4  }
  0x14   : > { %405 = sbr.rel (%p337_p10) target bundleno = 1917 (0x77d), region = 72 }
  0x15   : > { %p1124_p12 = pnand %p1131_p9, %p1123_p11 }
  0x16   : > { %s365_s22 = sshll.u32 %s1617_s7, 4  ;;  %s366_s22 = int_to_ptr.hbm [resolvable:$true] %s365_s22 }
  0x17   : > { %1126 = dma.hbm_to_vmem [thread:$0]  (!%p1124_p12), %s366_s22, 256, %s368_s24, [#allocation3], %s1314_s30, %s1314_s30, %s1315_s15  }
  0x19   : > { %1290 = dma.done.wait (%p1131_p9), [#allocation3], 256  }
  0x1a   : > { %1292 = vsyncadd (%p1131_p9), [#allocation3], 4294967040  ;;  %p449_p13 = scmp.lt.s32.totalorder %s1423_s29, 1  ;;  %s1618_s0 = sld [smem:[#allocation10_spill]]  ;;  %v1108_v0 = vld [vmem:[%s1597_s1 + $0x8] sm:$0xff]  ;;  %v1107_v1 = vld [vmem:[%s1597_s1] sm:$0xff]  ;;  %v456_v22 = vlaneseq }
  0x1b   : > { %492 = vmatpush.bf16.msra.mxu0 %v1108_v0  ;;  %vm482_vm0 = vcmask 261120   ;;  %v1185_v4 = vld [vmem:[%s1598_s2] ss:$0 sm:$0xff]  ;;  %s1317_s27 = smov 120   ;;  %s1318_s17 = smov 96   ;;  %vm505_vm1 = vcmask 64512  }
  0x1c   : > { %s450_s16 = scalar_select %p449_p13, %s1423_s29, 1  ;;  %v457_v23 = vshrl.u32 %v456_v22, 7  ;;  %v459_v24 = vand.u32 127, %v456_v22  ;;  %v1323_v25 = vmov 0.0   ;;  %vm542_vm3 = vcmask 1043456  }
  0x1d   : > { %s1321_s21 = smov 88   ;;  %s1322_s23 = smov 112   ;;  %vm749_vm4 = vcmask 130048   ;;  %vm752_vm5 = vcmask 195584   ;;  %vm905_vm10 = vcmask 523264  }
  0x1e   : > { %s1050_s20 = sshll.u32 %s450_s16, 3  ;;  %s1319_s16 = smov 80   ;;  %vm460_vm2 = vcmp.gt.s32.totalorder %v459_v24, %v457_v23 }
  0x1f   : > { %493 = vmatpush.bf16.msra.mxu0 %v1107_v1  ;;  %v461_v26 = vsel %vm460_vm2, -1e+09, %v1323_v25  ;;  %s1324_s22 = smov 64   ;;  %s1325_s24 = smov 40  }
  0x20   : > { %s452_s7 = scalar_lea.vmem %s1618_s0, %s1050_s20  ;;  %s1320_s20 = smov 72  }
  0x21   : > { %v1471_v2 = vld [vmem:[%s452_s7] sm:$0xff]  ;;  %s1316_s7 = smov 104   ;;  %s1326_s30 = smov 56  }
  0x22   : > { %v455_v3 = vpack.c.bf16 %v1471_v2, %v1471_v2  ;;  %s1327_s15 = smov 48  }
  0x24   : > { %1059 = vmatmul.msk.bf16.vlgmr.msra.gmra.mxu0 %vm482_vm0, %v455_v3 }
  0xa1   : > { %v495_v5 = vpop.f32.mrf.mxu0 }
  0xa2   : > { %v496_v6 = vadd.f32 %v1185_v4, %v495_v5 }
  0xa4   : > { %v499_v7 = vpack.c.bf16 %v496_v6, %v496_v6 }
  0xa6   : > { %v501_v8 = vunpack.c.l.b16 %v499_v7 }
  0xa8   : > { %v1479_v9 = vpack.c.b16 %v501_v8, %v501_v8 }
  0xa9   : > { %v497_v10 = vpop.f32.mrf.mxu0 }
  0xaa   : > { %674 = vrot.lane.b32.xlu2 %v1479_v9, %s1316_s7  ;;  %560 = vrot.lane.b32.xlu1 %v1479_v9, %s1317_s27  ;;  %s1328_s7 = smov 8   ;;  %s1329_s27 = smov 16  }
  0xab   : > { %503 = vrot.lane.b32.xlu0 %v1479_v9, %s1318_s17  ;;  %s1330_s17 = smov 24  }
  0xb2   : > { %619 = vrot.lane.b32.xlu2 %v1479_v9, %s1319_s16  ;;  %676 = vrot.lane.b32.xlu1 %v1479_v9, %s1320_s20  ;;  %s446_s16 = sand.u32 1, %s1303_s26  }
  0xb3   : > { %562 = vrot.lane.b32.xlu0 %v1479_v9, %s1321_s21  ;;  %s1049_s20 = sshll.u32 %s446_s16, 3  ;;  %s1104_s21 = sshll.u32 %s1423_s29, 3 }
  0xbb   : > { %617 = vrot.lane.b32.xlu0 %v1479_v9, %s1322_s23  ;;  %s957_s23 = scalar_lea.sflag [#allocation4], %s446_s16 }
 0x104   : > { %v675_v11 = vpop.permute.xlu2 %674 }
 0x10c   : > { %v620_v12 = vpop.permute.xlu2 %619 }
 0x10d   : > { %v625_v13 = vsel %vm505_vm1, %v620_v12, 0 }
 0x10e   : > { %634 = vmatpush.bf16.xpose.msrb.mxu0 %v625_v13 }
 0x11c   : > { %v561_v14 = vpop.permute.xlu1 %560 }
 0x11d   : > { %v504_v15 = vpop.permute.xlu0 %503 }
 0x11e   : > { %v510_v16 = vsel %vm505_vm1, %v504_v15, 0 }
 0x11f   : > { %519 = vmatpush.bf16.xpose.msra.mxu1 %v510_v16 }
 0x124   : > { %v677_v17 = vpop.permute.xlu1 %676 }
 0x125   : > { %v563_v18 = vpop.permute.xlu0 %562  ;;  %v682_v19 = vsel %vm505_vm1, %v677_v17, 0 }
 0x126   : > { %1060 = vmatmul.msk.bf16.vlgmr.msra.gmra.mxu1 %vm505_vm1, %v499_v7  ;;  %v568_v20 = vsel %vm505_vm1, %v563_v18, 0 }
 0x127   : > { %577 = vmatpush.bf16.xpose.msra.mxu3 %v568_v20 }
 0x12d   : > { %v618_v21 = vpop.permute.xlu0 %617 }
 0x12e   : > { %1062 = vmatmul.msk.bf16.vlgmr.msra.gmra.mxu3 %vm505_vm1, %v561_v14  ;;  %1064 = vmatmul.msk.bf16.vlgmr.msrb.gmra.mxu0 %vm505_vm1, %v618_v21 }
 0x12f   : > { %691 = vmatpush.bf16.xpose.msrb.mxu3 %v682_v19 }
 0x13e   : > { %1066 = vmatmul.msk.bf16.vlgmr.msrb.gmra.mxu3 %vm505_vm1, %v675_v11 }
 0x1a3   : > { %v521_v27 = vpop.f32.mrf.mxu1 }
 0x1a4   : > { %v522_v28 = vadd.f32 %v521_v27, %v461_v26 }
 0x1a6   : > { %v525_v29 = vsel %vm505_vm1, %v522_v28, -inf }
 0x1a7   : > { %526 = vmax.xlane.f32.xlu1 %v525_v29 }
 0x1ab   : > { %v523_v30 = vpop.f32.mrf.mxu1  ;;  %v636_v31 = vpop.f32.mrf.mxu0 }
 0x1ac   : > { %v637_v36 = vadd.f32 %v636_v31, %v461_v26 }
 0x1ae   : > { %v640_v38 = vsel %vm505_vm1, %v637_v36, -inf }
 0x1b1   : > { %v579_v32 = vpop.f32.mrf.mxu3 }
 0x1b2   : > { %v580_v33 = vadd.f32 %v579_v32, %v461_v26 }
 0x1b3   : > { %v638_v34 = vpop.f32.mrf.mxu0 }
 0x1b4   : > { %v583_v35 = vsel %vm505_vm1, %v580_v33, -inf }
 0x1b5   : > { %584 = vmax.xlane.f32.xlu2 %v583_v35 }
 0x1b9   : > { %v581_v37 = vpop.f32.mrf.mxu3 }
 0x1bd   : > { %641 = vmax.xlane.f32.xlu2 %v640_v38 }
 0x1c1   : > { %v693_v39 = vpop.f32.mrf.mxu3 }
 0x1c2   : > { %v694_v40 = vadd.f32 %v693_v39, %v461_v26 }
 0x1c4   : > { %v697_v41 = vsel %vm505_vm1, %v694_v40, -inf }
 0x1c5   : > { %698 = vmax.xlane.f32.xlu0 %v697_v41  ;;  %v1110_v41 = vld [vmem:[%s1599_s3 + $0x8] sm:$0xff] }
 0x1c6   : > { %783 = vmatpush.bf16.msra.mxu0 %v1110_v41 }
 0x1c9   : > { %v695_v42 = vpop.f32.mrf.mxu3 }
 0x1ca   : > { %v1109_v42 = vld [vmem:[%s1599_s3] sm:$0xff] }
 0x1cb   : > { %784 = vmatpush.bf16.msra.mxu0 %v1109_v42 }
 0x1d5   : > { %537 = vrot.lane.b32.xlu2 %v1479_v9, %s1324_s22 }
 0x1dd   : > { %709 = vrot.lane.b32.xlu2 %v1479_v9, %s1325_s24 }
 0x21a   : > { %v527_v43 = vpop.xlane.xlu1 %526 }
 0x21b   : > { %v528_v44 = vsub.f32 %v522_v28, %v527_v43 }
 0x21d   : > { %v529_v45 = vmul.f32 1.442695, %v528_v44 }
 0x21f   : > { %1193 = vpow2.f32 %v529_v45 }
 0x225   : > { %v1194_v46 = vpop.eup %1193 }
 0x226   : > { %v531_v47 = vsel %vm505_vm1, %v1194_v46, 0.0 }
 0x227   : > { %532 = vadd.xlane.f32.xlu1 %v531_v47 }
 0x228   : > { %v585_v48 = vpop.xlane.xlu2 %584 }
 0x229   : > { %v586_v51 = vsub.f32 %v580_v33, %v585_v48 }
 0x22b   : > { %v587_v53 = vmul.f32 1.442695, %v586_v51 }
 0x230   : > { %v642_v49 = vpop.xlane.xlu2 %641 }
 0x231   : > { %v643_v50 = vsub.f32 %v637_v36, %v642_v49 }
 0x233   : > { %v644_v52 = vmul.f32 1.442695, %v643_v50  ;;  %v1186_v50 = vld [vmem:[%s1600_s4] ss:$0 sm:$0xff] }
 0x235   : > { %1195 = vpow2.f32 %v644_v52 }
 0x236   : > { %1197 = vpow2.f32 %v587_v53 }
 0x238   : > { %v538_v54 = vpop.permute.xlu2 %537  ;;  %v699_v55 = vpop.xlane.xlu0 %698 }
 0x239   : > { %v544_v56 = vsel %vm542_vm3, %v538_v54, 0  ;;  %v700_v58 = vsub.f32 %v694_v40, %v699_v55 }
 0x23a   : > { %553 = vmatpush.bf16.msra.mxu2 %v544_v56  ;;  %v1331_v56 = vmov 32.0  }
 0x23b   : > { %v1196_v57 = vpop.eup %1195  ;;  %v701_v60 = vmul.f32 1.442695, %v700_v58 }
 0x23c   : > { %v646_v59 = vsel %vm505_vm1, %v1196_v57, 0.0  ;;  %v1198_v61 = vpop.eup %1197 }
 0x23d   : > { %647 = vadd.xlane.f32.xlu0 %v646_v59  ;;  %1199 = vpow2.f32 %v701_v60  ;;  %v589_v62 = vsel %vm505_vm1, %v1198_v61, 0.0 }
 0x240   : > { %595 = vrot.lane.b32.xlu1 %v1479_v9, %s1326_s30  ;;  %v710_v7 = vpop.permute.xlu2 %709 }
 0x241   : > { %v715_v11 = vsel %vm542_vm3, %v710_v7, 0 }
 0x243   : > { %v1200_v63 = vpop.eup %1199 }
 0x244   : > { %v703_v0 = vsel %vm505_vm1, %v1200_v63, 0.0 }
 0x245   : > { %590 = vadd.xlane.f32.xlu0 %v589_v62 }
 0x24d   : > { %704 = vadd.xlane.f32.xlu0 %v703_v0 }
 0x261   : > { %652 = vrot.lane.b32.xlu0 %v1479_v9, %s1327_s15  ;;  %s967_s15 = scalar_lea.hbm %s1609_s13, %s1104_s21 }
 0x262   : > { %s971_s0 = sshll.u32 %s967_s15, 4  ;;  %s972_s0 = int_to_ptr.hbm [resolvable:$true] %s971_s0 }
 0x263   : > { %s1259_s22 = sshra.s32 %s972_s0, 4  ;;  %s1260_s22 = int_to_ptr.hbm [resolvable:$true] %s1259_s22 }
 0x264   : > { %s1261_s21 = scalar_lea.hbm %s1260_s22, 8  ;;  %p1266_p3 = scmp.lt.s32.totalorder %s1260_s22, %s1609_s13 }
 0x265   : > { %p1262_p0 = scmp.ne.s32.totalorder %s1260_s22, %s1261_s21 }
 0x267   : > { %p1263_p1 = pnand %p1262_p0, %p1440_p5 }
 0x269   : > { %p1264_p2 = pneg %p1263_p1 }
 0x29a   : > { %v533_v1 = vpop.xlane.xlu1 %532 }
 0x29b   : > { %1201 = vrcp.f32 %v533_v1 }
 0x2a1   : > { %v1202_v3 = vpop.eup %1201 }
 0x2a2   : > { %v535_v4 = vmul.f32 %v1202_v3, %v1194_v46 }
 0x2a4   : > { %v536_v5 = vpack.c.bf16 %v535_v4, %v535_v4 }
 0x2a6   : > { %1061 = vmatmul.msk.bf16.vlgmr.msra.gmra.mxu2 %vm505_vm1, %v536_v5  ;;  %v1111_v5 = vld [vmem:[#allocation2] sm:$0xff] }
 0x2b0   : > { %v648_v6 = vpop.xlane.xlu0 %647 }
 0x2b2   : > { %v596_v8 = vpop.permute.xlu1 %595 }
 0x2b3   : > { %v601_v10 = vsel %vm542_vm3, %v596_v8, 0 }
 0x2b4   : > { %610 = vmatpush.bf16.msrb.mxu2 %v601_v10  ;;  %v1115_v10 = vld [vmem:[%s1605_s9 + $0x10] sm:$0xff] }
 0x2b8   : > { %724 = vmatpush.bf16.msra.mxu2 %v715_v11  ;;  %v591_v12 = vpop.xlane.xlu0 %590 }
 0x2b9   : > { %1203 = vrcp.f32 %v591_v12  ;;  %v1114_v12 = vld [vmem:[%s1605_s9 + $0x8] sm:$0xff] }
 0x2bf   : > { %v1204_v13 = vpop.eup %1203 }
 0x2c0   : > { %v593_v9 = vmul.f32 %v1204_v13, %v1198_v61  ;;  %v705_v14 = vpop.xlane.xlu0 %704 }
 0x2c1   : > { %1205 = vrcp.f32 %v705_v14 }
 0x2c2   : > { %v594_v15 = vpack.c.bf16 %v593_v9, %v593_v9  ;;  %1207 = vrcp.f32 %v648_v6  ;;  %v1116_v6 = vld [vmem:[%s1605_s9 + $0x18] sm:$0xff] }
 0x2c3   : > { %1209 = vrcp.f32 %v1331_v56  ;;  %913 = vmatpush.bf16.msra.mxu3 %v1116_v6 }
 0x2c4   : > { %1063 = vmatmul.msk.bf16.vlgmr.msrb.gmra.mxu2 %vm505_vm1, %v594_v15 }
 0x2c7   : > { %v1206_v16 = vpop.eup %1205  ;;  %914 = vmatpush.bf16.msra.mxu3 %v1115_v10 }
 0x2c8   : > { %v707_v17 = vmul.f32 %v1206_v16, %v1200_v63  ;;  %v1208_v18 = vpop.eup %1207 }
 0x2c9   : > { %v650_v19 = vmul.f32 %v1208_v18, %v1196_v57  ;;  %v1210_v57 = vpop.eup %1209  ;;  %v1187_v18 = vld [vmem:[%s1601_s5] ss:$0 sm:$0xff] }
 0x2ca   : > { %v708_v20 = vpack.c.bf16 %v707_v17, %v707_v17  ;;  %v797_v58 = vmul.f32 32.0, %v1210_v57  ;;  %vm801_vm6 = vweird.f32 %v1210_v57 }
 0x2cb   : > { %v651_v23 = vpack.c.bf16 %v650_v19, %v650_v19  ;;  %915 = vmatpush.bf16.msra.mxu3 %v1114_v12 }
 0x2cc   : > { %v798_v59 = vsub.f32 1.0, %v797_v58 }
 0x2ce   : > { %v799_v60 = vmul.f32 %v1210_v57, %v798_v59 }
 0x2d0   : > { %v800_v61 = vadd.f32 %v1210_v57, %v799_v60 }
 0x2d2   : > { %v802_v62 = vsel %vm801_vm6, %v1210_v57, %v800_v61 }
 0x2d3   : > { %v653_v21 = vpop.permute.xlu0 %652 }
 0x2d4   : > { %1067 = vmatmul.msk.bf16.vlgmr.msra.gmra.mxu2 %vm505_vm1, %v708_v20  ;;  %v658_v22 = vsel %vm542_vm3, %v653_v21, 0  ;;  %v1188_v20 = vld [vmem:[%s1602_s6] ss:$0 sm:$0xff] }
 0x2d5   : > { %667 = vmatpush.bf16.msrb.mxu1 %v658_v22 }
 0x2d8   : > { %1065 = vmatmul.msk.bf16.vlgmr.msrb.gmra.mxu1 %vm505_vm1, %v651_v23 }
 0x329   : > { %v555_v24 = vpop.f32.mrf.mxu2 }
 0x32a   : > { %v559_v44 = vpack.c.bf16 %v555_v24, %v555_v24 }
 0x331   : > { %v557_v25 = vpop.f32.mrf.mxu2 }
 0x332   : > { %v1113_v25 = vld [vmem:[%s1605_s9] sm:$0xff] }
 0x333   : > { %916 = vmatpush.bf16.msra.mxu3 %v1113_v25 }
 0x347   : > { %v612_v26 = vpop.f32.mrf.mxu2 }
 0x348   : > { %v616_v27 = vpack.c.bf16 %v612_v26, %v612_v26  ;;  %v1189_v26 = vld [vmem:[%s1604_s8] ss:$0 sm:$0xff] }
 0x34a   : > { %v732_v28 = vunpack.c.l.b16 %v616_v27 }
 0x34c   : > { %v733_v29 = vpack.c.b16 %v732_v28, %v732_v28 }
 0x34e   : > { %734 = vrot.lane.b32.xlu1 %v733_v29, %s1328_s7 }
 0x34f   : > { %v614_v30 = vpop.f32.mrf.mxu2 }
 0x355   : > { %v669_v31 = vpop.f32.mrf.mxu1 }
 0x356   : > { %v673_v32 = vpack.c.bf16 %v669_v31, %v669_v31 }
 0x357   : > { %v726_v33 = vpop.f32.mrf.mxu2 }
 0x358   : > { %v737_v34 = vunpack.c.l.b16 %v673_v32  ;;  %v730_v35 = vpack.c.bf16 %v726_v33, %v726_v33  ;;  %v1190_v32 = vld [vmem:[%s1606_s10] ss:$0 sm:$0xff] }
 0x35a   : > { %v738_v36 = vpack.c.b16 %v737_v34, %v737_v34  ;;  %v742_v37 = vunpack.c.l.b16 %v730_v35 }
 0x35c   : > { %v743_v38 = vpack.c.b16 %v742_v37, %v742_v37  ;;  %739 = vrot.lane.b32.xlu2 %v738_v36, %s1329_s27 }
 0x35d   : > { %v671_v39 = vpop.f32.mrf.mxu1 }
 0x35e   : > { %744 = vrot.lane.b32.xlu1 %v743_v38, %s1330_s17  ;;  %s448_s17 = scalar_lea.vmem [#allocation5], %s1049_s20  ;;  %s1265_s20 = scalar_lea.hbm %s1609_s13, 16 }
 0x35f   : > { %v728_v40 = vpop.f32.mrf.mxu2  ;;  %s969_s29 = sshll.u32 %s448_s17, 4  ;;  %p1267_p4 = scmp.lt.s32.totalorder %s1265_s20, %s1261_s21  ;;  %s970_s29 = int_to_ptr.vmem [resolvable:$true] %s969_s29 }
 0x361   : > { %p1268_p7 = por %p1267_p4, %p1266_p3 }
 0x363   : > { %p1269_p8 = pnand %p1268_p7, %p1264_p2 }
 0x3b6   : > { %v740_v46 = vpop.permute.xlu2 %739 }
 0x3c0   : > { %v735_v43 = vpop.permute.xlu1 %734 }
 0x3c1   : > { %v748_v45 = vsel %vm505_vm1, %v559_v44, %v735_v43 }
 0x3c2   : > { %v751_v48 = vsel %vm749_vm4, %v748_v45, %v740_v46 }
 0x3d0   : > { %v745_v47 = vpop.permute.xlu1 %744 }
 0x3d1   : > { %v754_v49 = vsel %vm752_vm5, %v751_v48, %v745_v47 }
 0x3d2   : > { %1076 = vmatmul.msk.bf16.vlgmr.msra.gmra.mxu0 %vm482_vm0, %v754_v49 }
 0x44f   : > { %v786_v51 = vpop.f32.mrf.mxu0 }
 0x450   : > { %v787_v52 = vadd.f32 %v1186_v50, %v786_v51 }
 0x452   : > { %v790_v53 = vadd.f32 %v787_v52, %v1471_v2  ;;  %v1112_v2 = vld [vmem:[#allocation2 + $0x8] sm:$0xff]  ;;  %v1191_v52 = vld [vmem:[%s1607_s11] ss:$0 sm:$0xff] }
 0x453   : > { %860 = vmatpush.bf16.msra.mxu1 %v1112_v2 }
 0x454   : > { %v793_v54 = vsel %vm482_vm0, %v790_v53, 0.0 }
 0x455   : > { %794 = vadd.xlane.f32.xlu2 %v793_v54 }
 0x457   : > { %v788_v55 = vpop.f32.mrf.mxu0  ;;  %861 = vmatpush.bf16.msra.mxu1 %v1111_v5 }
 0x458   : > { %v1192_v55 = vld [vmem:[%s1608_s12] ss:$0 sm:$0xff] }
 0x4c8   : > { %v795_v63 = vpop.xlane.xlu2 %794 }
 0x4c9   : > { %v803_v0 = vmul.f32 %v802_v62, %v795_v63 }
 0x4cb   : > { %v804_v1 = vsub.f32 %v790_v53, %v803_v0 }
 0x4cd   : > { %v805_v3 = vmul.f32 %v804_v1, %v804_v1 }
 0x4cf   : > { %v806_v4 = vsel %vm482_vm0, %v805_v3, 0.0 }
 0x4d0   : > { %807 = vadd.xlane.f32.xlu1 %v806_v4 }
 0x543   : > { %v808_v7 = vpop.xlane.xlu1 %807 }
 0x544   : > { %v809_v8 = vmul.f32 %v808_v7, %v802_v62 }
 0x546   : > { %v810_v11 = vadd.f32 1e-05, %v809_v8 }
 0x548   : > { %1211 = vrsqrt.f32 %v810_v11  ;;  %vm817_vm8 = vweird.f32 %v810_v11 }
 0x54e   : > { %v1212_v13 = vpop.eup %1211 }
 0x54f   : > { %v812_v9 = vmul.f32 %v1212_v13, %v810_v11  ;;  %vm818_vm7 = vweird.f32 %v1212_v13 }
 0x550   : > { %vm819_vm9 = vmor %vm817_vm8, %vm818_vm7 }
 0x551   : > { %v813_v14 = vmul.f32 %v1212_v13, %v812_v9 }
 0x553   : > { %v814_v15 = vmul.f32 0.5, %v813_v14 }
 0x555   : > { %v815_v16 = vsub.f32 1.5, %v814_v15 }
 0x557   : > { %v816_v17 = vmul.f32 %v1212_v13, %v815_v16 }
 0x559   : > { %v820_v19 = vsel %vm819_vm9, %v1212_v13, %v816_v17 }
 0x55a   : > { %v821_v21 = vmul.f32 %v820_v19, %v804_v1 }
 0x55c   : > { %v825_v22 = vmul.f32 %v1187_v18, %v821_v21 }
 0x55e   : > { %v829_v23 = vadd.f32 %v1188_v20, %v825_v22 }
 0x560   : > { %v830_v24 = vpack.c.bf16 %v829_v23, %v829_v23 }
 0x562   : > { %1085 = vmatmul.msk.bf16.vlgmr.msra.gmra.mxu1 %vm482_vm0, %v830_v24 }
 0x5df   : > { %v863_v27 = vpop.f32.mrf.mxu1 }
 0x5e0   : > { %v864_v28 = vadd.f32 %v1189_v26, %v863_v27 }
 0x5e2   : > { %v867_v29 = vmax.f32 %v864_v28, 0.0 }
 0x5e4   : > { %v868_v30 = vpack.c.bf16 %v867_v29, %v867_v29 }
 0x5e6   : > { %1102 = vmatmul.msk.bf16.vlgmr.msra.gmra.mxu3 %vm905_vm10, %v868_v30 }
 0x5e7   : > { %v865_v31 = vpop.f32.mrf.mxu1 }
 0x669   : > { %v918_v33 = vpop.f32.mrf.mxu3 }
 0x66a   : > { %v919_v34 = vadd.f32 %v1190_v32, %v918_v33 }
 0x66c   : > { %v922_v35 = vadd.f32 %v919_v34, %v829_v23 }
 0x66e   : > { %v925_v36 = vsel %vm482_vm0, %v922_v35, 0.0 }
 0x66f   : > { %926 = vadd.xlane.f32.xlu0 %v925_v36 }
 0x671   : > { %v920_v37 = vpop.f32.mrf.mxu3 }
 0x6e2   : > { %v927_v38 = vpop.xlane.xlu0 %926 }
 0x6e3   : > { %v928_v39 = vmul.f32 %v927_v38, %v802_v62 }
 0x6e5   : > { %v929_v40 = vsub.f32 %v922_v35, %v928_v39 }
 0x6e7   : > { %v930_v41 = vmul.f32 %v929_v40, %v929_v40 }
 0x6e9   : > { %v931_v42 = vsel %vm482_vm0, %v930_v41, 0.0 }
 0x6ea   : > { %932 = vadd.xlane.f32.xlu2 %v931_v42 }
 0x75d   : > { %v933_v43 = vpop.xlane.xlu2 %932 }
 0x75e   : > { %v934_v44 = vmul.f32 %v933_v43, %v802_v62 }
 0x760   : > { %v935_v45 = vadd.f32 1e-05, %v934_v44 }
 0x762   : > { %1213 = vrsqrt.f32 %v935_v45  ;;  %vm942_vm12 = vweird.f32 %v935_v45 }
 0x768   : > { %v1214_v46 = vpop.eup %1213 }
 0x769   : > { %v937_v47 = vmul.f32 %v1214_v46, %v935_v45  ;;  %vm943_vm11 = vweird.f32 %v1214_v46 }
 0x76a   : > { %vm944_vm13 = vmor %vm942_vm12, %vm943_vm11 }
 0x76b   : > { %v938_v48 = vmul.f32 %v1214_v46, %v937_v47 }
 0x76d   : > { %v939_v49 = vmul.f32 0.5, %v938_v48 }
 0x76f   : > { %v940_v50 = vsub.f32 1.5, %v939_v49 }
 0x771   : > { %v941_v51 = vmul.f32 %v1214_v46, %v940_v50 }
 0x773   : > { %v945_v53 = vsel %vm944_vm13, %v1214_v46, %v941_v51 }
 0x774   : > { %v946_v54 = vmul.f32 %v945_v53, %v929_v40 }
 0x776   : > { %v950_v56 = vmul.f32 %v1191_v52, %v946_v54 }
 0x778   : > { %v954_v57 = vadd.f32 %v1192_v55, %v950_v56 }
 0x77a   : > { %955 = vst.msk [vmem:[%s448_s17] sm:$0xff] %vm482_vm0, %v954_v57 }
 0x77b   : > { %1272 = shalt.err (!%p1269_p8)
}
 0x77c   : > { %1121 = dma.vmem_to_hbm [thread:$0]  (%p1440_p5), %s970_s29, 128, %s972_s0, %s957_s23  }
 0x77d PF: > { %p1133_p9 = scmp.ge.s32.totalorder %s1311_s28, 2  ;;  %s983_s16 = sand.u32 1, %s1299_s25  }
 0x77e   : > { %s984_s27 = scalar_lea.sflag [#allocation4], %s983_s16 }
 0x77f   : > { %p1128_p10 = pnand %p1133_p9, %p1444_p6 }
 0x781   : > { %p1129_p11 = pneg %p1128_p10 }
 0x783   : > { %1294 = dma.done.wait (%p1129_p11), %s984_s27, 128  }
 0x784   : > { %1296 = vsyncadd (%p1129_p11), %s984_s27, 4294967168  ;;  %s1619_s17 = sld [smem:[#allocation8_spill]]  ;;  %p24_p12 = scmp.ge.s32.totalorder %s1427_s14, 4  }
 0x785   : > { %s1620_s27 = sld [smem:[#allocation9_spill]]  ;;  %s1621_s25 = smov %s1303_s26 }
 0x786   : > { %s1623_s28 = smov %s1427_s14  ;;  %26 = sbr.rel (!%p24_p12) target bundleno = 7 (0x7), region = 112 }
 0x78a   : > { %s1622_s26 = smov %s1619_s17 }
 0x78b   :  { %990 = vsyncpa [#allocation3], 1 }
 0x78c   :  { %992 = vsyncpa [#allocation3 + $0x1], 1 }
 0x78d   :  { %993 = vsyncpa [#allocation4], 1 }
 0x78e   :  { %995 = vsyncpa [#allocation4 + $0x1], 1 }

// kernel: tpu_custom_call.1
= control target key start
LH: loop header
LB: loop body
LE: loop exit
PB: predicated region body
PF: predicated region fallthrough
CT: control target
= control target key end

     0   :  { %s1596_s0 = inlined_call_operand.vmem [shape: f32[2,8,32], index: 0, kind: input, shape index: {}]   ;;  %s1597_s1 = inlined_call_operand.vmem [shape: bf16[32,96], index: 1, kind: input, shape index: {}]   ;;  %s1598_s2 = inlined_call_operand.vmem [shape: f32[1,96], index: 2, kind: input, shape index: {}]   ;;  %s1599_s3 = inlined_call_operand.vmem [shape: bf16[32,32], index: 3, kind: input, shape index: {}]   ;;  %s1600_s4 = inlined_call_operand.vmem [shape: f32[1,32], index: 4, kind: input, shape index: {}]   ;;  %s1601_s5 = inlined_call_operand.vmem [shape: f32[1,32], index: 5, kind: input, shape index: {}]   ;;  %s1602_s6 = inlined_call_operand.vmem [shape: f32[1,32], index: 6, kind: input, shape index: {}]   ;;  %s1603_s7 = inlined_call_operand.hbm [shape: bf16[32,64], index: 7, kind: input, shape index: {}]   ;;  %s1604_s8 = inlined_call_operand.vmem [shape: f32[1,64], index: 8, kind: input, shape index: {}]   ;;  %s1605_s9 = inlined_call_operand.vmem [shape: bf16[64,32], index: 9, kind: input, shape index: {}]   ;;  %s1606_s10 = inlined_call_operand.vmem [shape: f32[1,32], index: 10, kind: input, shape index: {}]   ;;  %s1607_s11 = inlined_call_operand.vmem [shape: f32[1,32], index: 11, kind: input, shape index: {}]   ;;  %s1608_s12 = inlined_call_operand.vmem [shape: f32[1,32], index: 12, kind: input, shape index: {}]   ;;  %s1609_s13 = inlined_call_operand.hbm [shape: f32[2,8,32], index: 13, kind: output, shape index: {}]  }
   0x1   :  { %1611 = sst [smem:[#allocation10_spill]] %s1596_s0 }
   0x2   :  { %1612 = sst [smem:[#allocation11_spill]] %s1603_s7 }
   0x3   :  { %18 = vsyncpa [#allocation3], 0 }
   0x4   :  { %19 = vsyncpa [#allocation4], 0 }
   0x5   :  { %21 = vsyncpa [#allocation4 + $0x1], 0  ;;  %s1402_s25 = smov 0   ;;  %s1404_s26 = smov 0  }
   0x6   :  { %s1406_s27 = smov 0   ;;  %s1408_s28 = smov 0  }
   0x7 LB: > { %1613 = sst [smem:[#allocation8_spill]] %s1307_s27  ;;  %s1423_s29 = sadd.s32 4294967295, %s1311_s28   ;;  %s1311_s28 = sphi %s1408_s28, %s1623_s28   ;;  %s1307_s27 = sphi %s1406_s27, %s1620_s27   ;;  %s1303_s26 = sphi %s1404_s26, %s1622_s26   ;;  %s1299_s25 = sphi %s1402_s25, %s1621_s25  }
   0x8   : > { %s1043_s30 = sadd.s32 4294967294, %s1311_s28   ;;  %s1427_s14 = sadd.s32 1, %s1311_s28  }
   0x9   : > { %s312_s15 = sadd.s32 1, %s1307_s27  ;;  %s309_s16 = ssub.s32 %s1311_s28, %s1427_s14 }
   0xa   : > { %p322_p0 = scmp.ne.s32.totalorder %s1307_s27, %s1303_s26  ;;  %p310_p1 = scmp.eq.s32.totalorder %s309_s16, 0 }
   0xb   : > { %p323_p2 = scmp.eq.s32.totalorder %s1423_s29, 1  ;;  %p328_p3 = scmp.ne.s32.totalorder %s1303_s26, %s1299_s25 }
   0xc   : > { %p329_p4 = scmp.eq.s32.totalorder %s1043_s30, 1  ;;  %p1044_p7 = scmp.ge.s32.totalorder %s1311_s28, 1 }
   0xd   : > { %s1438_s17 = scalar_select %p310_p1, %s1307_s27, %s312_s15  }
   0xe   : > { %p1440_p5 = por %p323_p2, %p322_p0  ;;  %p1444_p6 = por %p329_p4, %p328_p3 }
   0xf   : > { %1614 = sst [smem:[#allocation9_spill]] %s1438_s17  ;;  %p336_p8 = scmp.lt.s32.totalorder %s1311_s28, 3 }
  0x10   : > { %p1131_p9 = scmp.eq.s32.totalorder %s1423_s29, 0  ;;  %s1617_s7 = sld [smem:[#allocation11_spill]] }
  0x11   : > { %p337_p10 = pnand %p1044_p7, %p336_p8  ;;  %s1313_s23 = smov [#allocation2]  }
  0x12   : > { %s367_s24 = sshll.u32 %s1313_s23, 4  ;;  %s1314_s30 = smov 64   ;;  %s368_s24 = int_to_ptr.vmem [resolvable:$true] %s367_s24 }
  0x13   : > { %p1123_p11 = pneg %p337_p10  ;;  %s1315_s15 = smov 4  }
  0x14   : > { %405 = sbr.rel (%p337_p10) target bundleno = 1917 (0x77d), region = 72 }
  0x15   : > { %p1124_p12 = pnand %p1131_p9, %p1123_p11 }
  0x16   : > { %s365_s22 = sshll.u32 %s1617_s7, 4  ;;  %s366_s22 = int_to_ptr.hbm [resolvable:$true] %s365_s22 }
  0x17   : > { %1126 = dma.hbm_to_vmem [thread:$0]  (!%p1124_p12), %s366_s22, 256, %s368_s24, [#allocation3], %s1314_s30, %s1314_s30, %s1315_s15  }
  0x19   : > { %1290 = dma.done.wait (%p1131_p9), [#allocation3], 256  }
  0x1a   : > { %1292 = vsyncadd (%p1131_p9), [#allocation3], 4294967040  ;;  %p449_p13 = scmp.lt.s32.totalorder %s1423_s29, 1  ;;  %s1618_s0 = sld [smem:[#allocation10_spill]]  ;;  %v1108_v0 = vld [vmem:[%s1597_s1 + $0x8] sm:$0xff]  ;;  %v1107_v1 = vld [vmem:[%s1597_s1] sm:$0xff]  ;;  %v456_v22 = vlaneseq }
  0x1b   : > { %492 = vmatpush.bf16.msra.mxu0 %v1108_v0  ;;  %vm482_vm0 = vcmask 261120   ;;  %v1185_v4 = vld [vmem:[%s1598_s2] ss:$0 sm:$0xff]  ;;  %s1317_s27 = smov 120   ;;  %s1318_s17 = smov 96   ;;  %vm505_vm1 = vcmask 64512  }
  0x1c   : > { %s450_s16 = scalar_select %p449_p13, %s1423_s29, 1  ;;  %v457_v23 = vshrl.u32 %v456_v22, 7  ;;  %v459_v24 = vand.u32 127, %v456_v22  ;;  %v1323_v25 = vmov 0.0   ;;  %vm542_vm3 = vcmask 1043456  }
  0x1d   : > { %s1321_s21 = smov 88   ;;  %s1322_s23 = smov 112   ;;  %vm749_vm4 = vcmask 130048   ;;  %vm752_vm5 = vcmask 195584   ;;  %vm905_vm10 = vcmask 523264  }
  0x1e   : > { %s1050_s20 = sshll.u32 %s450_s16, 3  ;;  %s1319_s16 = smov 80   ;;  %vm460_vm2 = vcmp.gt.s32.totalorder %v459_v24, %v457_v23 }
  0x1f   : > { %493 = vmatpush.bf16.msra.mxu0 %v1107_v1  ;;  %v461_v26 = vsel %vm460_vm2, -1e+09, %v1323_v25  ;;  %s1324_s22 = smov 64   ;;  %s1325_s24 = smov 40  }
  0x20   : > { %s452_s7 = scalar_lea.vmem %s1618_s0, %s1050_s20  ;;  %s1320_s20 = smov 72  }
  0x21   : > { %v1471_v2 = vld [vmem:[%s452_s7] sm:$0xff]  ;;  %s1316_s7 = smov 104   ;;  %s1326_s30 = smov 56  }
  0x22   : > { %v455_v3 = vpack.c.bf16 %v1471_v2, %v1471_v2  ;;  %s1327_s15 = smov 48  }
  0x24   : > { %1059 = vmatmul.msk.bf16.vlgmr.msra.gmra.mxu0 %vm482_vm0, %v455_v3 }
  0xa1   : > { %v495_v5 = vpop.f32.mrf.mxu0 }
  0xa2   : > { %v496_v6 = vadd.f32 %v1185_v4, %v495_v5 }
  0xa4   : > { %v499_v7 = vpack.c.bf16 %v496_v6, %v496_v6 }
  0xa6   : > { %v501_v8 = vunpack.c.l.b16 %v499_v7 }
  0xa8   : > { %v1479_v9 = vpack.c.b16 %v501_v8, %v501_v8 }
  0xa9   : > { %v497_v10 = vpop.f32.mrf.mxu0 }
  0xaa   : > { %674 = vrot.lane.b32.xlu2 %v1479_v9, %s1316_s7  ;;  %560 = vrot.lane.b32.xlu1 %v1479_v9, %s1317_s27  ;;  %s1328_s7 = smov 8   ;;  %s1329_s27 = smov 16  }
  0xab   : > { %503 = vrot.lane.b32.xlu0 %v1479_v9, %s1318_s17  ;;  %s1330_s17 = smov 24  }
  0xb2   : > { %619 = vrot.lane.b32.xlu2 %v1479_v9, %s1319_s16  ;;  %676 = vrot.lane.b32.xlu1 %v1479_v9, %s1320_s20  ;;  %s446_s16 = sand.u32 1, %s1303_s26  }
  0xb3   : > { %562 = vrot.lane.b32.xlu0 %v1479_v9, %s1321_s21  ;;  %s1049_s20 = sshll.u32 %s446_s16, 3  ;;  %s1104_s21 = sshll.u32 %s1423_s29, 3 }
  0xbb   : > { %617 = vrot.lane.b32.xlu0 %v1479_v9, %s1322_s23  ;;  %s957_s23 = scalar_lea.sflag [#allocation4], %s446_s16 }
 0x104   : > { %v675_v11 = vpop.permute.xlu2 %674 }
 0x10c   : > { %v620_v12 = vpop.permute.xlu2 %619 }
 0x10d   : > { %v625_v13 = vsel %vm505_vm1, %v620_v12, 0 }
 0x10e   : > { %634 = vmatpush.bf16.xpose.msrb.mxu0 %v625_v13 }
 0x11c   : > { %v561_v14 = vpop.permute.xlu1 %560 }
 0x11d   : > { %v504_v15 = vpop.permute.xlu0 %503 }
 0x11e   : > { %v510_v16 = vsel %vm505_vm1, %v504_v15, 0 }
 0x11f   : > { %519 = vmatpush.bf16.xpose.msra.mxu1 %v510_v16 }
 0x124   : > { %v677_v17 = vpop.permute.xlu1 %676 }
 0x125   : > { %v563_v18 = vpop.permute.xlu0 %562  ;;  %v682_v19 = vsel %vm505_vm1, %v677_v17, 0 }
 0x126   : > { %1060 = vmatmul.msk.bf16.vlgmr.msra.gmra.mxu1 %vm505_vm1, %v499_v7  ;;  %v568_v20 = vsel %vm505_vm1, %v563_v18, 0 }
 0x127   : > { %577 = vmatpush.bf16.xpose.msra.mxu3 %v568_v20 }
 0x12d   : > { %v618_v21 = vpop.permute.xlu0 %617 }
 0x12e   : > { %1062 = vmatmul.msk.bf16.vlgmr.msra.gmra.mxu3 %vm505_vm1, %v561_v14  ;;  %1064 = vmatmul.msk.bf16.vlgmr.msrb.gmra.mxu0 %vm505_vm1, %v618_v21 }
 0x12f   : > { %691 = vmatpush.bf16.xpose.msrb.mxu3 %v682_v19 }
 0x13e   : > { %1066 = vmatmul.msk.bf16.vlgmr.msrb.gmra.mxu3 %vm505_vm1, %v675_v11 }
 0x1a3   : > { %v521_v27 = vpop.f32.mrf.mxu1 }
 0x1a4   : > { %v522_v28 = vadd.f32 %v521_v27, %v461_v26 }
 0x1a6   : > { %v525_v29 = vsel %vm505_vm1, %v522_v28, -inf }
 0x1a7   : > { %526 = vmax.xlane.f32.xlu1 %v525_v29 }
 0x1ab   : > { %v523_v30 = vpop.f32.mrf.mxu1  ;;  %v636_v31 = vpop.f32.mrf.mxu0 }
 0x1ac   : > { %v637_v36 = vadd.f32 %v636_v31, %v461_v26 }
 0x1ae   : > { %v640_v38 = vsel %vm505_vm1, %v637_v36, -inf }
 0x1b1   : > { %v579_v32 = vpop.f32.mrf.mxu3 }
 0x1b2   : > { %v580_v33 = vadd.f32 %v579_v32, %v461_v26 }
 0x1b3   : > { %v638_v34 = vpop.f32.mrf.mxu0 }
 0x1b4   : > { %v583_v35 = vsel %vm505_vm1, %v580_v33, -inf }
 0x1b5   : > { %584 = vmax.xlane.f32.xlu2 %v583_v35 }
 0x1b9   : > { %v581_v37 = vpop.f32.mrf.mxu3 }
 0x1bd   : > { %641 = vmax.xlane.f32.xlu2 %v640_v38 }
 0x1c1   : > { %v693_v39 = vpop.f32.mrf.mxu3 }
 0x1c2   : > { %v694_v40 = vadd.f32 %v693_v39, %v461_v26 }
 0x1c4   : > { %v697_v41 = vsel %vm505_vm1, %v694_v40, -inf }
 0x1c5   : > { %698 = vmax.xlane.f32.xlu0 %v697_v41  ;;  %v1110_v41 = vld [vmem:[%s1599_s3 + $0x8] sm:$0xff] }
 0x1c6   : > { %783 = vmatpush.bf16.msra.mxu0 %v1110_v41 }
 0x1c9   : > { %v695_v42 = vpop.f32.mrf.mxu3 }
 0x1ca   : > { %v1109_v42 = vld [vmem:[%s1599_s3] sm:$0xff] }
 0x1cb   : > { %784 = vmatpush.bf16.msra.mxu0 %v1109_v42 }
 0x1d5   : > { %537 = vrot.lane.b32.xlu2 %v1479_v9, %s1324_s22 }
 0x1dd   : > { %709 = vrot.lane.b32.xlu2 %v1479_v9, %s1325_s24 }
 0x21a   : > { %v527_v43 = vpop.xlane.xlu1 %526 }
 0x21b   : > { %v528_v44 = vsub.f32 %v522_v28, %v527_v43 }
 0x21d   : > { %v529_v45 = vmul.f32 1.442695, %v528_v44 }
 0x21f   : > { %1193 = vpow2.f32 %v529_v45 }
 0x225   : > { %v1194_v46 = vpop.eup %1193 }
 0x226   : > { %v531_v47 = vsel %vm505_vm1, %v1194_v46, 0.0 }
 0x227   : > { %532 = vadd.xlane.f32.xlu1 %v531_v47 }
 0x228   : > { %v585_v48 = vpop.xlane.xlu2 %584 }
 0x229   : > { %v586_v51 = vsub.f32 %v580_v33, %v585_v48 }
 0x22b   : > { %v587_v53 = vmul.f32 1.442695, %v586_v51 }
 0x230   : > { %v642_v49 = vpop.xlane.xlu2 %641 }
 0x231   : > { %v643_v50 = vsub.f32 %v637_v36, %v642_v49 }
 0x233   : > { %v644_v52 = vmul.f32 1.442695, %v643_v50  ;;  %v1186_v50 = vld [vmem:[%s1600_s4] ss:$0 sm:$0xff] }
 0x235   : > { %1195 = vpow2.f32 %v644_v52 }
 0x236   : > { %1197 = vpow2.f32 %v587_v53 }
 0x238   : > { %v538_v54 = vpop.permute.xlu2 %537  ;;  %v699_v55 = vpop.xlane.xlu0 %698 }
 0x239   : > { %v544_v56 = vsel %vm542_vm3, %v538_v54, 0  ;;  %v700_v58 = vsub.f32 %v694_v40, %v699_v55 }
 0x23a   : > { %553 = vmatpush.bf16.msra.mxu2 %v544_v56  ;;  %v1331_v56 = vmov 32.0  }
 0x23b   : > { %v1196_v57 = vpop.eup %1195  ;;  %v701_v60 = vmul.f32 1.442695, %v700_v58 }
 0x23c   : > { %v646_v59 = vsel %vm505_vm1, %v1196_v57, 0.0  ;;  %v1198_v61 = vpop.eup %1197 }
 0x23d   : > { %647 = vadd.xlane.f32.xlu0 %v646_v59  ;;  %1199 = vpow2.f32 %v701_v60  ;;  %v589_v62 = vsel %vm505_vm1, %v1198_v61, 0.0 }
 0x240   : > { %595 = vrot.lane.b32.xlu1 %v1479_v9, %s1326_s30  ;;  %v710_v7 = vpop.permute.xlu2 %709 }
 0x241   : > { %v715_v11 = vsel %vm542_vm3, %v710_v7, 0 }
 0x243   : > { %v1200_v63 = vpop.eup %1199 }
 0x244   : > { %v703_v0 = vsel %vm505_vm1, %v1200_v63, 0.0 }
 0x245   : > { %590 = vadd.xlane.f32.xlu0 %v589_v62 }
 0x24d   : > { %704 = vadd.xlane.f32.xlu0 %v703_v0 }
 0x261   : > { %652 = vrot.lane.b32.xlu0 %v1479_v9, %s1327_s15  ;;  %s967_s15 = scalar_lea.hbm %s1609_s13, %s1104_s21 }
 0x262   : > { %s971_s0 = sshll.u32 %s967_s15, 4  ;;  %s972_s0 = int_to_ptr.hbm [resolvable:$true] %s971_s0 }
 0x263   : > { %s1259_s22 = sshra.s32 %s972_s0, 4  ;;  %s1260_s22 = int_to_ptr.hbm [resolvable:$true] %s1259_s22 }
 0x264   : > { %s1261_s21 = scalar_lea.hbm %s1260_s22, 8  ;;  %p1266_p3 = scmp.lt.s32.totalorder %s1260_s22, %s1609_s13 }
 0x265   : > { %p1262_p0 = scmp.ne.s32.totalorder %s1260_s22, %s1261_s21 }
 0x267   : > { %p1263_p1 = pnand %p1262_p0, %p1440_p5 }
 0x269   : > { %p1264_p2 = pneg %p1263_p1 }
 0x29a   : > { %v533_v1 = vpop.xlane.xlu1 %532 }
 0x29b   : > { %1201 = vrcp.f32 %v533_v1 }
 0x2a1   : > { %v1202_v3 = vpop.eup %1201 }
 0x2a2   : > { %v535_v4 = vmul.f32 %v1202_v3, %v1194_v46 }
 0x2a4   : > { %v536_v5 = vpack.c.bf16 %v535_v4, %v535_v4 }
 0x2a6   : > { %1061 = vmatmul.msk.bf16.vlgmr.msra.gmra.mxu2 %vm505_vm1, %v536_v5  ;;  %v1111_v5 = vld [vmem:[#allocation2] sm:$0xff] }
 0x2b0   : > { %v648_v6 = vpop.xlane.xlu0 %647 }
 0x2b2   : > { %v596_v8 = vpop.permute.xlu1 %595 }
 0x2b3   : > { %v601_v10 = vsel %vm542_vm3, %v596_v8, 0 }
 0x2b4   : > { %610 = vmatpush.bf16.msrb.mxu2 %v601_v10  ;;  %v1115_v10 = vld [vmem:[%s1605_s9 + $0x10] sm:$0xff] }
 0x2b8   : > { %724 = vmatpush.bf16.msra.mxu2 %v715_v11  ;;  %v591_v12 = vpop.xlane.xlu0 %590 }
 0x2b9   : > { %1203 = vrcp.f32 %v591_v12  ;;  %v1114_v12 = vld [vmem:[%s1605_s9 + $0x8] sm:$0xff] }
 0x2bf   : > { %v1204_v13 = vpop.eup %1203 }
 0x2c0   : > { %v593_v9 = vmul.f32 %v1204_v13, %v1198_v61  ;;  %v705_v14 = vpop.xlane.xlu0 %704 }
 0x2c1   : > { %1205 = vrcp.f32 %v705_v14 }
 0x2c2   : > { %v594_v15 = vpack.c.bf16 %v593_v9, %v593_v9  ;;  %1207 = vrcp.f32 %v648_v6  ;;  %v1116_v6 = vld [vmem:[%s1605_s9 + $0x18] sm:$0xff] }
 0x2c3   : > { %1209 = vrcp.f32 %v1331_v56  ;;  %913 = vmatpush.bf16.msra.mxu3 %v1116_v6 }
 0x2c4   : > { %1063 = vmatmul.msk.bf16.vlgmr.msrb.gmra.mxu2 %vm505_vm1, %v594_v15 }
 0x2c7   : > { %v1206_v16 = vpop.eup %1205  ;;  %914 = vmatpush.bf16.msra.mxu3 %v1115_v10 }
 0x2c8   : > { %v707_v17 = vmul.f32 %v1206_v16, %v1200_v63  ;;  %v1208_v18 = vpop.eup %1207 }
 0x2c9   : > { %v650_v19 = vmul.f32 %v1208_v18, %v1196_v57  ;;  %v1210_v57 = vpop.eup %1209  ;;  %v1187_v18 = vld [vmem:[%s1601_s5] ss:$0 sm:$0xff] }
 0x2ca   : > { %v708_v20 = vpack.c.bf16 %v707_v17, %v707_v17  ;;  %v797_v58 = vmul.f32 32.0, %v1210_v57  ;;  %vm801_vm6 = vweird.f32 %v1210_v57 }
 0x2cb   : > { %v651_v23 = vpack.c.bf16 %v650_v19, %v650_v19  ;;  %915 = vmatpush.bf16.msra.mxu3 %v1114_v12 }
 0x2cc   : > { %v798_v59 = vsub.f32 1.0, %v797_v58 }
 0x2ce   : > { %v799_v60 = vmul.f32 %v1210_v57, %v798_v59 }
 0x2d0   : > { %v800_v61 = vadd.f32 %v1210_v57, %v799_v60 }
 0x2d2   : > { %v802_v62 = vsel %vm801_vm6, %v1210_v57, %v800_v61 }
 0x2d3   : > { %v653_v21 = vpop.permute.xlu0 %652 }
 0x2d4   : > { %1067 = vmatmul.msk.bf16.vlgmr.msra.gmra.mxu2 %vm505_vm1, %v708_v20  ;;  %v658_v22 = vsel %vm542_vm3, %v653_v21, 0  ;;  %v1188_v20 = vld [vmem:[%s1602_s6] ss:$0 sm:$0xff] }
 0x2d5   : > { %667 = vmatpush.bf16.msrb.mxu1 %v658_v22 }
 0x2d8   : > { %1065 = vmatmul.msk.bf16.vlgmr.msrb.gmra.mxu1 %vm505_vm1, %v651_v23 }
 0x329   : > { %v555_v24 = vpop.f32.mrf.mxu2 }
 0x32a   : > { %v559_v44 = vpack.c.bf16 %v555_v24, %v555_v24 }
 0x331   : > { %v557_v25 = vpop.f32.mrf.mxu2 }
 0x332   : > { %v1113_v25 = vld [vmem:[%s1605_s9] sm:$0xff] }
 0x333   : > { %916 = vmatpush.bf16.msra.mxu3 %v1113_v25 }
 0x347   : > { %v612_v26 = vpop.f32.mrf.mxu2 }
 0x348   : > { %v616_v27 = vpack.c.bf16 %v612_v26, %v612_v26  ;;  %v1189_v26 = vld [vmem:[%s1604_s8] ss:$0 sm:$0xff] }
 0x34a   : > { %v732_v28 = vunpack.c.l.b16 %v616_v27 }
 0x34c   : > { %v733_v29 = vpack.c.b16 %v732_v28, %v732_v28 }
 0x34e   : > { %734 = vrot.lane.b32.xlu1 %v733_v29, %s1328_s7 }
 0x34f   : > { %v614_v30 = vpop.f32.mrf.mxu2 }
 0x355   : > { %v669_v31 = vpop.f32.mrf.mxu1 }
 0x356   : > { %v673_v32 = vpack.c.bf16 %v669_v31, %v669_v31 }
 0x357   : > { %v726_v33 = vpop.f32.mrf.mxu2 }
 0x358   : > { %v737_v34 = vunpack.c.l.b16 %v673_v32  ;;  %v730_v35 = vpack.c.bf16 %v726_v33, %v726_v33  ;;  %v1190_v32 = vld [vmem:[%s1606_s10] ss:$0 sm:$0xff] }
 0x35a   : > { %v738_v36 = vpack.c.b16 %v737_v34, %v737_v34  ;;  %v742_v37 = vunpack.c.l.b16 %v730_v35 }
 0x35c   : > { %v743_v38 = vpack.c.b16 %v742_v37, %v742_v37  ;;  %739 = vrot.lane.b32.xlu2 %v738_v36, %s1329_s27 }
 0x35d   : > { %v671_v39 = vpop.f32.mrf.mxu1 }
 0x35e   : > { %744 = vrot.lane.b32.xlu1 %v743_v38, %s1330_s17  ;;  %s448_s17 = scalar_lea.vmem [#allocation5], %s1049_s20  ;;  %s1265_s20 = scalar_lea.hbm %s1609_s13, 16 }
 0x35f   : > { %v728_v40 = vpop.f32.mrf.mxu2  ;;  %s969_s29 = sshll.u32 %s448_s17, 4  ;;  %p1267_p4 = scmp.lt.s32.totalorder %s1265_s20, %s1261_s21  ;;  %s970_s29 = int_to_ptr.vmem [resolvable:$true] %s969_s29 }
 0x361   : > { %p1268_p7 = por %p1267_p4, %p1266_p3 }
 0x363   : > { %p1269_p8 = pnand %p1268_p7, %p1264_p2 }
 0x3b6   : > { %v740_v46 = vpop.permute.xlu2 %739 }
 0x3c0   : > { %v735_v43 = vpop.permute.xlu1 %734 }
 0x3c1   : > { %v748_v45 = vsel %vm505_vm1, %v559_v44, %v735_v43 }
 0x3c2   : > { %v751_v48 = vsel %vm749_vm4, %v748_v45, %v740_v46 }
 0x3d0   : > { %v745_v47 = vpop.permute.xlu1 %744 }
 0x3d1   : > { %v754_v49 = vsel %vm752_vm5, %v751_v48, %v745_v47 }
 0x3d2   : > { %1076 = vmatmul.msk.bf16.vlgmr.msra.gmra.mxu0 %vm482_vm0, %v754_v49 }
 0x44f   : > { %v786_v51 = vpop.f32.mrf.mxu0 }
 0x450   : > { %v787_v52 = vadd.f32 %v1186_v50, %v786_v51 }
 0x452   : > { %v790_v53 = vadd.f32 %v787_v52, %v1471_v2  ;;  %v1112_v2 = vld [vmem:[#allocation2 + $0x8] sm:$0xff]  ;;  %v1191_v52 = vld [vmem:[%s1607_s11] ss:$0 sm:$0xff] }
 0x453   : > { %860 = vmatpush.bf16.msra.mxu1 %v1112_v2 }
 0x454   : > { %v793_v54 = vsel %vm482_vm0, %v790_v53, 0.0 }
 0x455   : > { %794 = vadd.xlane.f32.xlu2 %v793_v54 }
 0x457   : > { %v788_v55 = vpop.f32.mrf.mxu0  ;;  %861 = vmatpush.bf16.msra.mxu1 %v1111_v5 }
 0x458   : > { %v1192_v55 = vld [vmem:[%s1608_s12] ss:$0 sm:$0xff] }
 0x4c8   : > { %v795_v63 = vpop.xlane.xlu2 %794 }
 0x4c9   : > { %v803_v0 = vmul.f32 %v802_v62, %v795_v63 }
 0x4cb   : > { %v804_v1 = vsub.f32 %v790_v53, %v803_v0 }
 0x4cd   : > { %v805_v3 = vmul.f32 %v804_v1, %v804_v1 }
 0x4cf   : > { %v806_v4 = vsel %vm482_vm0, %v805_v3, 0.0 }
 0x4d0   : > { %807 = vadd.xlane.f32.xlu1 %v806_v4 }
 0x543   : > { %v808_v7 = vpop.xlane.xlu1 %807 }
 0x544   : > { %v809_v8 = vmul.f32 %v808_v7, %v802_v62 }
 0x546   : > { %v810_v11 = vadd.f32 1e-05, %v809_v8 }
 0x548   : > { %1211 = vrsqrt.f32 %v810_v11  ;;  %vm817_vm8 = vweird.f32 %v810_v11 }
 0x54e   : > { %v1212_v13 = vpop.eup %1211 }
 0x54f   : > { %v812_v9 = vmul.f32 %v1212_v13, %v810_v11  ;;  %vm818_vm7 = vweird.f32 %v1212_v13 }
 0x550   : > { %vm819_vm9 = vmor %vm817_vm8, %vm818_vm7 }
 0x551   : > { %v813_v14 = vmul.f32 %v1212_v13, %v812_v9 }
 0x553   : > { %v814_v15 = vmul.f32 0.5, %v813_v14 }
 0x555   : > { %v815_v16 = vsub.f32 1.5, %v814_v15 }
 0x557   : > { %v816_v17 = vmul.f32 %v1212_v13, %v815_v16 }
 0x559   : > { %v820_v19 = vsel %vm819_vm9, %v1212_v13, %v816_v17 }
 0x55a   : > { %v821_v21 = vmul.f32 %v820_v19, %v804_v1 }
 0x55c   : > { %v825_v22 = vmul.f32 %v1187_v18, %v821_v21 }
 0x55e   : > { %v829_v23 = vadd.f32 %v1188_v20, %v825_v22 }
 0x560   : > { %v830_v24 = vpack.c.bf16 %v829_v23, %v829_v23 }
 0x562   : > { %1085 = vmatmul.msk.bf16.vlgmr.msra.gmra.mxu1 %vm482_vm0, %v830_v24 }
 0x5df   : > { %v863_v27 = vpop.f32.mrf.mxu1 }
 0x5e0   : > { %v864_v28 = vadd.f32 %v1189_v26, %v863_v27 }
 0x5e2   : > { %v867_v29 = vmax.f32 %v864_v28, 0.0 }
 0x5e4   : > { %v868_v30 = vpack.c.bf16 %v867_v29, %v867_v29 }
 0x5e6   : > { %1102 = vmatmul.msk.bf16.vlgmr.msra.gmra.mxu3 %vm905_vm10, %v868_v30 }
 0x5e7   : > { %v865_v31 = vpop.f32.mrf.mxu1 }
 0x669   : > { %v918_v33 = vpop.f32.mrf.mxu3 }
 0x66a   : > { %v919_v34 = vadd.f32 %v1190_v32, %v918_v33 }
 0x66c   : > { %v922_v35 = vadd.f32 %v919_v34, %v829_v23 }
 0x66e   : > { %v925_v36 = vsel %vm482_vm0, %v922_v35, 0.0 }
 0x66f   : > { %926 = vadd.xlane.f32.xlu0 %v925_v36 }
 0x671   : > { %v920_v37 = vpop.f32.mrf.mxu3 }
 0x6e2   : > { %v927_v38 = vpop.xlane.xlu0 %926 }
 0x6e3   : > { %v928_v39 = vmul.f32 %v927_v38, %v802_v62 }
 0x6e5   : > { %v929_v40 = vsub.f32 %v922_v35, %v928_v39 }
 0x6e7   : > { %v930_v41 = vmul.f32 %v929_v40, %v929_v40 }
 0x6e9   : > { %v931_v42 = vsel %vm482_vm0, %v930_v41, 0.0 }
 0x6ea   : > { %932 = vadd.xlane.f32.xlu2 %v931_v42 }
 0x75d   : > { %v933_v43 = vpop.xlane.xlu2 %932 }
 0x75e   : > { %v934_v44 = vmul.f32 %v933_v43, %v802_v62 }
 0x760   : > { %v935_v45 = vadd.f32 1e-05, %v934_v44 }
 0x762   : > { %1213 = vrsqrt.f32 %v935_v45  ;;  %vm942_vm12 = vweird.f32 %v935_v45 }
 0x768   : > { %v1214_v46 = vpop.eup %1213 }
 0x769   : > { %v937_v47 = vmul.f32 %v1214_v46, %v935_v45  ;;  %vm943_vm11 = vweird.f32 %v1214_v46 }
 0x76a   : > { %vm944_vm13 = vmor %vm942_vm12, %vm943_vm11 }
 0x76b   : > { %v938_v48 = vmul.f32 %v1214_v46, %v937_v47 }
 0x76d   : > { %v939_v49 = vmul.f32 0.5, %v938_v48 }
 0x76f   : > { %v940_v50 = vsub.f32 1.5, %v939_v49 }
 0x771   : > { %v941_v51 = vmul.f32 %v1214_v46, %v940_v50 }
 0x773   : > { %v945_v53 = vsel %vm944_vm13, %v1214_v46, %v941_v51 }
 0x774   : > { %v946_v54 = vmul.f32 %v945_v53, %v929_v40 }
 0x776   : > { %v950_v56 = vmul.f32 %v1191_v52, %v946_v54 }
 0x778   : > { %v954_v57 = vadd.f32 %v1192_v55, %v950_v56 }
 0x77a   : > { %955 = vst.msk [vmem:[%s448_s17] sm:$0xff] %vm482_vm0, %v954_v57 }
 0x77b   : > { %1272 = shalt.err (!%p1269_p8)
}
 0x77c   : > { %1121 = dma.vmem_to_hbm [thread:$0]  (%p1440_p5), %s970_s29, 128, %s972_s0, %s957_s23  }
 0x77d PF: > { %p1133_p9 = scmp.ge.s32.totalorder %s1311_s28, 2  ;;  %s983_s16 = sand.u32 1, %s1299_s25  }
 0x77e   : > { %s984_s27 = scalar_lea.sflag [#allocation4], %s983_s16 }
 0x77f   : > { %p1128_p10 = pnand %p1133_p9, %p1444_p6 }
 0x781   : > { %p1129_p11 = pneg %p1128_p10 }
 0x783   : > { %1294 = dma.done.wait (%p1129_p11), %s984_s27, 128  }
 0x784   : > { %1296 = vsyncadd (%p1129_p11), %s984_s27, 4294967168  ;;  %s1619_s17 = sld [smem:[#allocation8_spill]]  ;;  %p24_p12 = scmp.ge.s32.totalorder %s1427_s14, 4  }
 0x785   : > { %s1620_s27 = sld [smem:[#allocation9_spill]]  ;;  %s1621_s25 = smov %s1303_s26 }
 0x786   : > { %s1623_s28 = smov %s1427_s14  ;;  %26 = sbr.rel (!%p24_p12) target bundleno = 7 (0x7), region = 112 }
 0x78a   : > { %s1622_s26 = smov %s1619_s17 }
 0x78b   :  { %990 = vsyncpa [#allocation3], 1 }
 0x78c   :  { %992 = vsyncpa [#allocation3 + $0x1], 1 }
 0x78d   :  { %993 = vsyncpa [#allocation4], 1 }
 0x78e   :  { %995 = vsyncpa [#allocation4 + $0x1], 1 }

</bundles_post_ra>
